<compile_context>
chip_gen: v7x
topology: tpu7x:2x2x1
jax: 0.10.0
libtpu: 0.0.40
codegen_flags: <defaults>
</compile_context>

<pallas_src>
import functools

import jax
import jax.numpy as jnp
from jax import lax
from jax.experimental import pallas as pl
from jax.experimental.pallas import tpu as pltpu


# ----------------------------------------------------------------------------- helpers
def _round_up(x, m):
    return (x + m - 1) // m * m


def _pick_lane_tile(dim, pref=512):
    """Largest multiple of 128 <= pref dividing dim (or the full dim if unaligned)."""
    if dim % 128 != 0:
        return dim
    t = min(pref, dim)
    t -= t % 128
    while dim % t != 0:
        t -= 128
    return t


def _pick_sublane_tile(dim, pref=256):
    if dim % 8 != 0:
        return dim
    t = min(pref, dim)
    t -= t % 8
    while dim % t != 0:
        t -= 8
    return t


def _vmem_limit(tile_bytes):
    """Scoped-VMEM limit sized to the chosen tiles (double-buffered) + headroom."""
    return int(min(max(2 * tile_bytes + (8 << 20), 16 << 20), 48 << 20))


def _project_l2_ball(z):
    # z / max(||z||_2, 1)  ==  z * min(rsqrt(sum z^2), 1)
    # (EUP rsqrt + VPU multiply instead of sqrt + maximum + divide).
    sumsq = jnp.sum(z * z, axis=1, keepdims=True)
    return z * jnp.minimum(lax.rsqrt(sumsq), 1.0)


# ----------------------------------------------------------------------------- kernels
def glo_precompute_kernel(img_ref, w_ref, b_ref, g_ref, c_ref):
    """Accumulate G = W W^T and C = (b - img) W^T over D-chunks (grid axis 0)."""
    @pl.when(pl.program_id(0) == 0)
    def _init():
        g_ref[...] = jnp.zeros_like(g_ref)
        c_ref[...] = jnp.zeros_like(c_ref)

    w = w_ref[...]                                       # (GP, TD) bf16
    # W W^T chunk: contract over D without materializing W^T.            [MXU]
    g_ref[...] += lax.dot_general(
        w, w, dimension_numbers=(((1,), (1,)), ((), ())),
        preferred_element_type=jnp.float32)
    # (b - img) W^T chunk; bias folded into the image exactly once.      [MXU]
    diff = b_ref[...] - img_ref[...]                     # (N, TD)
    c_ref[...] += lax.dot_general(
        diff, w, dimension_numbers=(((1,), (1,)), ((), ())),
        preferred_element_type=jnp.float32)


def glo_decode_kernel(z0_ref, c_ref, g_ref, wd_ref, bd_ref,
                      z_out_ref, logits_ref, z_scr,
                      *, num_steps, step_size, grad_scale):
    """Fixed-steps GLO latent optimization (GLO_DIM-sized) + fused decoder head."""
    # Run the SGD loop once per batch tile (first vocab tile only); keep the
    # optimized latent in VMEM scratch for the remaining vocab tiles.
    @pl.when(pl.program_id(1) == 0)
    def _optimize():
        z = _project_l2_ball(z0_ref[...])
        g = g_ref[...]
        c = c_ref[...]

        def step(_, z):
            # grad = (2/(N*D)) * (z @ G + C)   -- algebraic fold of (zW + b - img) W^T
            grad = grad_scale * (
                jnp.dot(z, g, preferred_element_type=jnp.float32) + c)
            return _project_l2_ball(z - step_size * grad)

        z = lax.fori_loop(0, num_steps, step, z, unroll=True)
        z_scr[...] = z
        z_out_ref[...] = z

    # Synthetic decoder: linear LM head over the (squeezed) inputs_embeds.
    # TODO(synk): real `decoder` is an arbitrary HF-style autoregressive model
    # taking inputs_embeds + extra **batch kwargs; synthesized as a linear head.
    logits_ref[...] = (
        jnp.dot(z_scr[...], wd_ref[...], preferred_element_type=jnp.float32)
        + bd_ref[...])


# ----------------------------------------------------------------------------- wrapper
def glo_captions_forward(images, z0, w_glo, b_glo, w_dec, b_dec, *,
                         num_steps, step_size):
    n = images.shape[0]
    d = images.shape[1] * images.shape[2] * images.shape[3]
    glo_dim = z0.shape[1]
    vocab = w_dec.shape[1]
    gp = _round_up(glo_dim, 128)      # pad latent dim to lane width (dense vst + MXU depth)

    # ---------------- stage 1: fold the D-sized data out of the loop (one pass over D).
    # bf16 MXU inputs halve HBM/VMEM traffic of the only D-sized pass; f32 accumulation.
    img_bf = images.reshape(n, d).astype(jnp.bfloat16)
    w_pad = jnp.pad(w_glo, ((0, gp - glo_dim), (0, 0))).astype(jnp.bfloat16)
    b_bf = b_glo.astype(jnp.bfloat16)

    td = _pick_lane_tile(d)
    grid_d = d // td
    bytes_a = (n + gp + 1) * td * 2 + (gp * gp + n * gp) * 4

    g_mat, c_mat = pl.pallas_call(
        glo_precompute_kernel,
        grid_spec=pltpu.PrefetchScalarGridSpec(
            num_scalar_prefetch=0,
            grid=(grid_d,),
            in_specs=[
                pl.BlockSpec((n, td), lambda k: (0, k)),     # images (flattened)
                pl.BlockSpec((gp, td), lambda k: (0, k)),    # W_glo (padded rows)
                pl.BlockSpec((1, td), lambda k: (0, k)),     # b_glo
            ],
            out_specs=[
                pl.BlockSpec((gp, gp), lambda k: (0, 0)),    # G accumulator (resident)
                pl.BlockSpec((n, gp), lambda k: (0, 0)),     # C accumulator (resident)
            ],
        ),
        out_shape=(jax.ShapeDtypeStruct((gp, gp), jnp.float32),
                   jax.ShapeDtypeStruct((n, gp), jnp.float32)),
        compiler_params=pltpu.CompilerParams(
            dimension_semantics=("arbitrary",),              # reduction over D
            vmem_limit_bytes=_vmem_limit(bytes_a)),
    )(img_bf, w_pad, b_bf)

    # ---------------- stage 2: SGD loop in GLO_DIM space + fused decoder matmul.
    z0_pad = jnp.pad(z0.astype(jnp.float32), ((0, 0), (0, gp - glo_dim)))
    wd_pad = jnp.pad(w_dec.astype(jnp.float32), ((0, gp - glo_dim), (0, 0)))

    tn = _pick_sublane_tile(n)
    tv = _pick_lane_tile(vocab)
    grid = (n // tn, vocab // tv)
    bytes_b = (2 * tn * gp + gp * gp + gp * tv + tv
               + tn * gp + tn * tv + tn * gp) * 4

    z_pad, logits = pl.pallas_call(
        functools.partial(glo_decode_kernel, num_steps=num_steps,
                          step_size=step_size, grad_scale=2.0 / (n * d)),
        grid_spec=pltpu.PrefetchScalarGridSpec(
            num_scalar_prefetch=0,
            grid=grid,
            in_specs=[
                pl.BlockSpec((tn, gp), lambda i, j: (i, 0)),   # z0 tile
                pl.BlockSpec((tn, gp), lambda i, j: (i, 0)),   # C tile
                pl.BlockSpec((gp, gp), lambda i, j: (0, 0)),   # G
                pl.BlockSpec((gp, tv), lambda i, j: (0, j)),   # W_dec tile
                pl.BlockSpec((1, tv), lambda i, j: (0, j)),    # b_dec tile
            ],
            out_specs=[
                pl.BlockSpec((tn, gp), lambda i, j: (i, 0)),   # z (lane-dense, padded)
                pl.BlockSpec((tn, tv), lambda i, j: (i, j)),   # logits (lane-dense)
            ],
            scratch_shapes=[pltpu.VMEM((tn, gp), jnp.float32)],
        ),
        out_shape=(jax.ShapeDtypeStruct((n, gp), jnp.float32),
                   jax.ShapeDtypeStruct((n, vocab), jnp.float32)),
        compiler_params=pltpu.CompilerParams(
            dimension_semantics=("parallel", "arbitrary"),     # batch shards across TCs (v7x)
            vmem_limit_bytes=_vmem_limit(bytes_b)),
    )(z0_pad, c_mat, g_mat, wd_pad, b_dec)

    z = z_pad[:, :glo_dim]
    # decoder(inputs_embeds=z.unsqueeze(1)) -> (N, 1, VOCAB)
    return z, logits[:, None, :]


# ----------------------------------------------------------------------------- reference
def reference_forward(images, z0, w_glo, b_glo, w_dec, b_dec, *, num_steps, step_size):
    """Pure-JAX f32 reference of the PyTorch semantics (for correctness checking)."""
    n = images.shape[0]
    d = images.shape[1] * images.shape[2] * images.shape[3]
    img = images.reshape(n, d).astype(jnp.float32)

    def project(z):
        norm = jnp.sqrt(jnp.sum(z * z, axis=1, keepdims=True))
        return z / jnp.maximum(norm, 1.0)

    z = project(z0)
    for _ in range(num_steps):
        recon = z @ w_glo + b_glo
        diff = recon - img
        grad = (2.0 / (n * d)) * (diff @ w_glo.T)
        z = project(z - step_size * grad)
    logits = z @ w_dec + b_dec
    return z, logits[:, None, :]


if __name__ == "__main__":
    # Small shapes consistent with the forward: NCHW images, glo_dim latent,
    # 1-token caption prefix (inputs_embeds of length 1).
    N, C, H, W = 2, 4, 16, 16
    GLO_DIM, VOCAB = 32, 128
    NUM_STEPS, STEP_SIZE = 20, 1e-3
    D = C * H * W

    key = jax.random.PRNGKey(0)
    kimg, kz, kw, kb, kwd, kbd = jax.random.split(key, 6)
    images = jax.random.normal(kimg, (N, C, H, W), jnp.float32)
    z0 = jax.random.normal(kz, (N, GLO_DIM), jnp.float32)             # torch.randn(n, glo_dim)
    w_glo = 0.05 * jax.random.normal(kw, (GLO_DIM, D), jnp.float32)   # glo generator weight
    b_glo = 0.05 * jax.random.normal(kb, (1, D), jnp.float32)         # glo generator bias
    w_dec = 0.05 * jax.random.normal(kwd, (GLO_DIM, VOCAB), jnp.float32)  # decoder head weight
    b_dec = 0.05 * jax.random.normal(kbd, (1, VOCAB), jnp.float32)        # decoder head bias

    fwd = jax.jit(functools.partial(glo_captions_forward,
                                    num_steps=NUM_STEPS, step_size=STEP_SIZE))
    z, logits = fwd(images, z0, w_glo, b_glo, w_dec, b_dec)
    jax.block_until_ready((z, logits))

    z_ref, logits_ref = reference_forward(images, z0, w_glo, b_glo, w_dec, b_dec,
                                          num_steps=NUM_STEPS, step_size=STEP_SIZE)

    assert z.shape == (N, GLO_DIM) and logits.shape == (N, 1, VOCAB)
    # bf16 MXU inputs in the one-shot precompute + rsqrt projection shift results
    # by ~1e-6 on z; tolerances account for that.
    assert jnp.allclose(z, z_ref, atol=2e-4), "z mismatch vs reference"
    assert jnp.allclose(logits, logits_ref, atol=1e-3), "logits mismatch vs reference"

    print("KERNEL_OK")
</pallas_src>

<mosaic_0001>
module attributes {stable_mosaic.version = 11 : i64} {
  func.func @glo_precompute_kernel(%arg0: i32, %arg1: memref<2x512xbf16, #tpu.memory_space<vmem>>, %arg2: memref<128x512xbf16, #tpu.memory_space<vmem>>, %arg3: memref<1x512xbf16, #tpu.memory_space<vmem>>, %arg4: memref<128x128xf32, #tpu.memory_space<vmem>>, %arg5: memref<2x128xf32, #tpu.memory_space<vmem>>) attributes {dimension_semantics = [#tpu.dimension_semantics<arbitrary>], iteration_bounds = array<i64: 2>, scalar_prefetch = 0 : i64, scratch_operands = 0 : i64, tpu.core_type = #tpu.core_type<tc>, window_params = [{transform_indices = @transform_0, window_bounds = array<i64: 2, 512>}, {transform_indices = @transform_1, window_bounds = array<i64: 128, 512>}, {transform_indices = @transform_2, window_bounds = array<i64: 1, 512>}, {pipeline_mode = #tpu.pipeline_mode<synchronous>, transform_indices = @transform_3, window_bounds = array<i64: 128, 128>}, {pipeline_mode = #tpu.pipeline_mode<synchronous>, transform_indices = @transform_4, window_bounds = array<i64: 2, 128>}]} {
    %c0_i32 = arith.constant 0 : i32
    %0 = arith.cmpi eq, %arg0, %c0_i32 : i32
    %1 = arith.extui %0 : i1 to i32
    %c0_i32_0 = arith.constant 0 : i32
    %2 = arith.cmpi ne, %1, %c0_i32_0 : i32
    scf.if %2 {
      %cst_15 = arith.constant 0.000000e+00 : f32
      %16 = vector.broadcast %cst_15 : f32 to vector<128x128xf32>
      %c0_16 = arith.constant 0 : index
      %c0_17 = arith.constant 0 : index
      %17 = vector.load %arg4[%c0_16, %c0_17] : memref<128x128xf32, #tpu.memory_space<vmem>>, vector<128x128xf32>
      tpu.vector_store %arg4[%c0_16, %c0_17], %16 {strides = array<i32>} : memref<128x128xf32, #tpu.memory_space<vmem>>, vector<128x128xf32>,
      %cst_18 = arith.constant 0.000000e+00 : f32
      %18 = vector.broadcast %cst_18 : f32 to vector<2x128xf32>
      %c0_19 = arith.constant 0 : index
      %c0_20 = arith.constant 0 : index
      %19 = vector.load %arg5[%c0_19, %c0_20] : memref<2x128xf32, #tpu.memory_space<vmem>>, vector<2x128xf32>
      tpu.vector_store %arg5[%c0_19, %c0_20], %18 {strides = array<i32>} : memref<2x128xf32, #tpu.memory_space<vmem>>, vector<2x128xf32>,
    } else {
    }
    %c0 = arith.constant 0 : index
    %c0_1 = arith.constant 0 : index
    %3 = vector.load %arg2[%c0, %c0_1] : memref<128x512xbf16, #tpu.memory_space<vmem>>, vector<128x512xbf16>
    %c0_2 = arith.constant 0 : index
    %c0_3 = arith.constant 0 : index
    %4 = vector.load %arg4[%c0_2, %c0_3] : memref<128x128xf32, #tpu.memory_space<vmem>>, vector<128x128xf32>
    %cst = arith.constant dense<0.000000e+00> : vector<128x128xf32>
    %5 = tpu.matmul %3, %3, %cst {dimension_numbers = #tpu.dot_dimension_numbers<[1], [1], [0], [0], [0, 0, 1, 0], [], []>} : vector<128x512xbf16>, vector<128x512xbf16>, vector<128x128xf32> -> vector<128x128xf32>
    %6 = arith.addf %4, %5 : vector<128x128xf32>
    %c0_4 = arith.constant 0 : index
    %c0_5 = arith.constant 0 : index
    %7 = vector.load %arg4[%c0_4, %c0_5] : memref<128x128xf32, #tpu.memory_space<vmem>>, vector<128x128xf32>
    tpu.vector_store %arg4[%c0_4, %c0_5], %6 {strides = array<i32>} : memref<128x128xf32, #tpu.memory_space<vmem>>, vector<128x128xf32>,
    %c0_6 = arith.constant 0 : index
    %c0_7 = arith.constant 0 : index
    %8 = vector.load %arg3[%c0_6, %c0_7] : memref<1x512xbf16, #tpu.memory_space<vmem>>, vector<1x512xbf16>
    %c0_8 = arith.constant 0 : index
    %c0_9 = arith.constant 0 : index
    %9 = vector.load %arg1[%c0_8, %c0_9] : memref<2x512xbf16, #tpu.memory_space<vmem>>, vector<2x512xbf16>
    %10 = vector.broadcast %8 : vector<1x512xbf16> to vector<2x512xbf16>
    %11 = arith.subf %10, %9 : vector<2x512xbf16>
    %c0_10 = arith.constant 0 : index
    %c0_11 = arith.constant 0 : index
    %12 = vector.load %arg5[%c0_10, %c0_11] : memref<2x128xf32, #tpu.memory_space<vmem>>, vector<2x128xf32>
    %cst_12 = arith.constant dense<0.000000e+00> : vector<2x128xf32>
    %13 = tpu.matmul %11, %3, %cst_12 {dimension_numbers = #tpu.dot_dimension_numbers<[1], [1], [0], [0], [0, 0, 1, 0], [], []>} : vector<2x512xbf16>, vector<128x512xbf16>, vector<2x128xf32> -> vector<2x128xf32>
    %14 = arith.addf %12, %13 : vector<2x128xf32>
    %c0_13 = arith.constant 0 : index
    %c0_14 = arith.constant 0 : index
    %15 = vector.load %arg5[%c0_13, %c0_14] : memref<2x128xf32, #tpu.memory_space<vmem>>, vector<2x128xf32>
    tpu.vector_store %arg5[%c0_13, %c0_14], %14 {strides = array<i32>} : memref<2x128xf32, #tpu.memory_space<vmem>>, vector<2x128xf32>,
    return
  }
  func.func @transform_0(%arg0: i32) -> (i32, i32) {
    %c0_i32 = arith.constant 0 : i32
    %c0_i32_0 = arith.constant 0 : i32
    return %c0_i32, %arg0 : i32, i32
  }
  func.func @transform_1(%arg0: i32) -> (i32, i32) {
    %c0_i32 = arith.constant 0 : i32
    %c0_i32_0 = arith.constant 0 : i32
    return %c0_i32, %arg0 : i32, i32
  }
  func.func @transform_2(%arg0: i32) -> (i32, i32) {
    %c0_i32 = arith.constant 0 : i32
    %c0_i32_0 = arith.constant 0 : i32
    return %c0_i32, %arg0 : i32, i32
  }
  func.func @transform_3(%arg0: i32) -> (i32, i32) {
    %c0_i32 = arith.constant 0 : i32
    %c0_i32_0 = arith.constant 0 : i32
    %c0_i32_1 = arith.constant 0 : i32
    return %c0_i32, %c0_i32_0 : i32, i32
  }
  func.func @transform_4(%arg0: i32) -> (i32, i32) {
    %c0_i32 = arith.constant 0 : i32
    %c0_i32_0 = arith.constant 0 : i32
    %c0_i32_1 = arith.constant 0 : i32
    return %c0_i32, %c0_i32_0 : i32, i32
  }
}

module attributes {stable_mosaic.version = 11 : i64} {
  func.func @glo_decode_kernel(%arg0: i32, %arg1: i32, %arg2: memref<2x128xf32, #tpu.memory_space<vmem>>, %arg3: memref<2x128xf32, #tpu.memory_space<vmem>>, %arg4: memref<128x128xf32, #tpu.memory_space<vmem>>, %arg5: memref<128x128xf32, #tpu.memory_space<vmem>>, %arg6: memref<1x128xf32, #tpu.memory_space<vmem>>, %arg7: memref<2x128xf32, #tpu.memory_space<vmem>>, %arg8: memref<2x128xf32, #tpu.memory_space<vmem>>, %arg9: memref<2x128xf32, #tpu.memory_space<vmem>>) attributes {dimension_semantics = [#tpu.dimension_semantics<parallel>, #tpu.dimension_semantics<arbitrary>], iteration_bounds = array<i64: 1, 1>, scalar_prefetch = 0 : i64, scratch_operands = 1 : i64, tpu.core_type = #tpu.core_type<tc>, window_params = [{transform_indices = @transform_0, window_bounds = array<i64: 2, 128>}, {transform_indices = @transform_1, window_bounds = array<i64: 2, 128>}, {pipeline_mode = #tpu.pipeline_mode<synchronous>, transform_indices = @transform_2, window_bounds = array<i64: 128, 128>}, {transform_indices = @transform_3, window_bounds = array<i64: 128, 128>}, {transform_indices = @transform_4, window_bounds = array<i64: 1, 128>}, {transform_indices = @transform_5, window_bounds = array<i64: 2, 128>}, {transform_indices = @transform_6, window_bounds = array<i64: 2, 128>}]} {
    %c0_i32 = arith.constant 0 : i32
    %0 = arith.cmpi eq, %arg1, %c0_i32 : i32
    %1 = arith.extui %0 : i1 to i32
    %c0_i32_0 = arith.constant 0 : i32
    %2 = arith.cmpi ne, %1, %c0_i32_0 : i32
    scf.if %2 {
      %c0_8 = arith.constant 0 : index
      %c0_9 = arith.constant 0 : index
      %10 = vector.load %arg2[%c0_8, %c0_9] : memref<2x128xf32, #tpu.memory_space<vmem>>, vector<2x128xf32>
      %11 = arith.mulf %10, %10 : vector<2x128xf32>
      %cst_10 = arith.constant dense<0.000000e+00> : vector<2xf32>
      %12 = vector.multi_reduction <add>, %11, %cst_10 [1] : vector<2x128xf32> to vector<2xf32>
      %13 = vector.shape_cast %12 : vector<2xf32> to vector<2x1xf32>
      %14 = math.rsqrt %13 : vector<2x1xf32>
      %cst_11 = arith.constant 1.000000e+00 : f32
      %15 = vector.broadcast %cst_11 : f32 to vector<2x1xf32>
      %16 = arith.minimumf %14, %15 : vector<2x1xf32>
      %17 = vector.broadcast %16 : vector<2x1xf32> to vector<2x128xf32>
      %18 = arith.mulf %10, %17 : vector<2x128xf32>
      %c0_12 = arith.constant 0 : index
      %c0_13 = arith.constant 0 : index
      %19 = vector.load %arg4[%c0_12, %c0_13] : memref<128x128xf32, #tpu.memory_space<vmem>>, vector<128x128xf32>
      %c0_14 = arith.constant 0 : index
      %c0_15 = arith.constant 0 : index
      %20 = vector.load %arg3[%c0_14, %c0_15] : memref<2x128xf32, #tpu.memory_space<vmem>>, vector<2x128xf32>
      %c0_i32_16 = arith.constant 0 : i32
      %cst_17 = arith.constant dense<0.000000e+00> : vector<2x128xf32>
      %21 = tpu.matmul %18, %19, %cst_17 {dimension_numbers = #tpu.dot_dimension_numbers<[1], [0], [0], [1], [0, 0, 1, 1], [], []>} : vector<2x128xf32>, vector<128x128xf32>, vector<2x128xf32> -> vector<2x128xf32>
      %22 = arith.addf %21, %20 : vector<2x128xf32>
      %cst_18 = arith.constant 9.765625E-4 : f32
      %23 = vector.broadcast %cst_18 : f32 to vector<2x128xf32>
      %24 = arith.mulf %23, %22 : vector<2x128xf32>
      %cst_19 = arith.constant 1.000000e-03 : f32
      %25 = vector.broadcast %cst_19 : f32 to vector<2x128xf32>
      %26 = arith.mulf %25, %24 : vector<2x128xf32>
      %27 = arith.subf %18, %26 : vector<2x128xf32>
      %28 = arith.mulf %27, %27 : vector<2x128xf32>
      %cst_20 = arith.constant dense<0.000000e+00> : vector<2xf32>
      %29 = vector.multi_reduction <add>, %28, %cst_20 [1] : vector<2x128xf32> to vector<2xf32>
      %30 = vector.shape_cast %29 : vector<2xf32> to vector<2x1xf32>
      %31 = math.rsqrt %30 : vector<2x1xf32>
      %cst_21 = arith.constant 1.000000e+00 : f32
      %32 = vector.broadcast %cst_21 : f32 to vector<2x1xf32>
      %33 = arith.minimumf %31, %32 : vector<2x1xf32>
      %34 = vector.broadcast %33 : vector<2x1xf32> to vector<2x128xf32>
      %35 = arith.mulf %27, %34 : vector<2x128xf32>
      %c1_i32 = arith.constant 1 : i32
      %cst_22 = arith.constant dense<0.000000e+00> : vector<2x128xf32>
      %36 = tpu.matmul %35, %19, %cst_22 {dimension_numbers = #tpu.dot_dimension_numbers<[1], [0], [0], [1], [0, 0, 1, 1], [], []>} : vector<2x128xf32>, vector<128x128xf32>, vector<2x128xf32> -> vector<2x128xf32>
      %37 = arith.addf %36, %20 : vector<2x128xf32>
      %cst_23 = arith.constant 9.765625E-4 : f32
      %38 = vector.broadcast %cst_23 : f32 to vector<2x128xf32>
      %39 = arith.mulf %38, %37 : vector<2x128xf32>
      %cst_24 = arith.constant 1.000000e-03 : f32
      %40 = vector.broadcast %cst_24 : f32 to vector<2x128xf32>
      %41 = arith.mulf %40, %39 : vector<2x128xf32>
      %42 = arith.subf %35, %41 : vector<2x128xf32>
      %43 = arith.mulf %42, %42 : vector<2x128xf32>
      %cst_25 = arith.constant dense<0.000000e+00> : vector<2xf32>
      %44 = vector.multi_reduction <add>, %43, %cst_25 [1] : vector<2x128xf32> to vector<2xf32>
      %45 = vector.shape_cast %44 : vector<2xf32> to vector<2x1xf32>
      %46 = math.rsqrt %45 : vector<2x1xf32>
      %cst_26 = arith.constant 1.000000e+00 : f32
      %47 = vector.broadcast %cst_26 : f32 to vector<2x1xf32>
      %48 = arith.minimumf %46, %47 : vector<2x1xf32>
      %49 = vector.broadcast %48 : vector<2x1xf32> to vector<2x128xf32>
      %50 = arith.mulf %42, %49 : vector<2x128xf32>
      %c2_i32 = arith.constant 2 : i32
      %cst_27 = arith.constant dense<0.000000e+00> : vector<2x128xf32>
      %51 = tpu.matmul %50, %19, %cst_27 {dimension_numbers = #tpu.dot_dimension_numbers<[1], [0], [0], [1], [0, 0, 1, 1], [], []>} : vector<2x128xf32>, vector<128x128xf32>, vector<2x128xf32> -> vector<2x128xf32>
      %52 = arith.addf %51, %20 : vector<2x128xf32>
      %cst_28 = arith.constant 9.765625E-4 : f32
      %53 = vector.broadcast %cst_28 : f32 to vector<2x128xf32>
      %54 = arith.mulf %53, %52 : vector<2x128xf32>
      %cst_29 = arith.constant 1.000000e-03 : f32
      %55 = vector.broadcast %cst_29 : f32 to vector<2x128xf32>
      %56 = arith.mulf %55, %54 : vector<2x128xf32>
      %57 = arith.subf %50, %56 : vector<2x128xf32>
      %58 = arith.mulf %57, %57 : vector<2x128xf32>
      %cst_30 = arith.constant dense<0.000000e+00> : vector<2xf32>
      %59 = vector.multi_reduction <add>, %58, %cst_30 [1] : vector<2x128xf32> to vector<2xf32>
      %60 = vector.shape_cast %59 : vector<2xf32> to vector<2x1xf32>
      %61 = math.rsqrt %60 : vector<2x1xf32>
      %cst_31 = arith.constant 1.000000e+00 : f32
      %62 = vector.broadcast %cst_31 : f32 to vector<2x1xf32>
      %63 = arith.minimumf %61, %62 : vector<2x1xf32>
      %64 = vector.broadcast %63 : vector<2x1xf32> to vector<2x128xf32>
      %65 = arith.mulf %57, %64 : vector<2x128xf32>
      %c3_i32 = arith.constant 3 : i32
      %cst_32 = arith.constant dense<0.000000e+00> : vector<2x128xf32>
      %66 = tpu.matmul %65, %19, %cst_32 {dimension_numbers = #tpu.dot_dimension_numbers<[1], [0], [0], [1], [0, 0, 1, 1], [], []>} : vector<2x128xf32>, vector<128x128xf32>, vector<2x128xf32> -> vector<2x128xf32>
      %67 = arith.addf %66, %20 : vector<2x128xf32>
      %cst_33 = arith.constant 9.765625E-4 : f32
      %68 = vector.broadcast %cst_33 : f32 to vector<2x128xf32>
      %69 = arith.mulf %68, %67 : vector<2x128xf32>
      %cst_34 = arith.constant 1.000000e-03 : f32
      %70 = vector.broadcast %cst_34 : f32 to vector<2x128xf32>
      %71 = arith.mulf %70, %69 : vector<2x128xf32>
      %72 = arith.subf %65, %71 : vector<2x128xf32>
      %73 = arith.mulf %72, %72 : vector<2x128xf32>
      %cst_35 = arith.constant dense<0.000000e+00> : vector<2xf32>
      %74 = vector.multi_reduction <add>, %73, %cst_35 [1] : vector<2x128xf32> to vector<2xf32>
      %75 = vector.shape_cast %74 : vector<2xf32> to vector<2x1xf32>
      %76 = math.rsqrt %75 : vector<2x1xf32>
      %cst_36 = arith.constant 1.000000e+00 : f32
      %77 = vector.broadcast %cst_36 : f32 to vector<2x1xf32>
      %78 = arith.minimumf %76, %77 : vector<2x1xf32>
      %79 = vector.broadcast %78 : vector<2x1xf32> to vector<2x128xf32>
      %80 = arith.mulf %72, %79 : vector<2x128xf32>
      %c4_i32 = arith.constant 4 : i32
      %cst_37 = arith.constant dense<0.000000e+00> : vector<2x128xf32>
      %81 = tpu.matmul %80, %19, %cst_37 {dimension_numbers = #tpu.dot_dimension_numbers<[1], [0], [0], [1], [0, 0, 1, 1], [], []>} : vector<2x128xf32>, vector<128x128xf32>, vector<2x128xf32> -> vector<2x128xf32>
      %82 = arith.addf %81, %20 : vector<2x128xf32>
      %cst_38 = arith.constant 9.765625E-4 : f32
      %83 = vector.broadcast %cst_38 : f32 to vector<2x128xf32>
      %84 = arith.mulf %83, %82 : vector<2x128xf32>
      %cst_39 = arith.constant 1.000000e-03 : f32
      %85 = vector.broadcast %cst_39 : f32 to vector<2x128xf32>
      %86 = arith.mulf %85, %84 : vector<2x128xf32>
      %87 = arith.subf %80, %86 : vector<2x128xf32>
      %88 = arith.mulf %87, %87 : vector<2x128xf32>
      %cst_40 = arith.constant dense<0.000000e+00> : vector<2xf32>
      %89 = vector.multi_reduction <add>, %88, %cst_40 [1] : vector<2x128xf32> to vector<2xf32>
      %90 = vector.shape_cast %89 : vector<2xf32> to vector<2x1xf32>
      %91 = math.rsqrt %90 : vector<2x1xf32>
      %cst_41 = arith.constant 1.000000e+00 : f32
      %92 = vector.broadcast %cst_41 : f32 to vector<2x1xf32>
      %93 = arith.minimumf %91, %92 : vector<2x1xf32>
      %94 = vector.broadcast %93 : vector<2x1xf32> to vector<2x128xf32>
      %95 = arith.mulf %87, %94 : vector<2x128xf32>
      %c5_i32 = arith.constant 5 : i32
      %cst_42 = arith.constant dense<0.000000e+00> : vector<2x128xf32>
      %96 = tpu.matmul %95, %19, %cst_42 {dimension_numbers = #tpu.dot_dimension_numbers<[1], [0], [0], [1], [0, 0, 1, 1], [], []>} : vector<2x128xf32>, vector<128x128xf32>, vector<2x128xf32> -> vector<2x128xf32>
      %97 = arith.addf %96, %20 : vector<2x128xf32>
      %cst_43 = arith.constant 9.765625E-4 : f32
      %98 = vector.broadcast %cst_43 : f32 to vector<2x128xf32>
      %99 = arith.mulf %98, %97 : vector<2x128xf32>
      %cst_44 = arith.constant 1.000000e-03 : f32
      %100 = vector.broadcast %cst_44 : f32 to vector<2x128xf32>
      %101 = arith.mulf %100, %99 : vector<2x128xf32>
      %102 = arith.subf %95, %101 : vector<2x128xf32>
      %103 = arith.mulf %102, %102 : vector<2x128xf32>
      %cst_45 = arith.constant dense<0.000000e+00> : vector<2xf32>
      %104 = vector.multi_reduction <add>, %103, %cst_45 [1] : vector<2x128xf32> to vector<2xf32>
      %105 = vector.shape_cast %104 : vector<2xf32> to vector<2x1xf32>
      %106 = math.rsqrt %105 : vector<2x1xf32>
      %cst_46 = arith.constant 1.000000e+00 : f32
      %107 = vector.broadcast %cst_46 : f32 to vector<2x1xf32>
      %108 = arith.minimumf %106, %107 : vector<2x1xf32>
      %109 = vector.broadcast %108 : vector<2x1xf32> to vector<2x128xf32>
      %110 = arith.mulf %102, %109 : vector<2x128xf32>
      %c6_i32 = arith.constant 6 : i32
      %cst_47 = arith.constant dense<0.000000e+00> : vector<2x128xf32>
      %111 = tpu.matmul %110, %19, %cst_47 {dimension_numbers = #tpu.dot_dimension_numbers<[1], [0], [0], [1], [0, 0, 1, 1], [], []>} : vector<2x128xf32>, vector<128x128xf32>, vector<2x128xf32> -> vector<2x128xf32>
      %112 = arith.addf %111, %20 : vector<2x128xf32>
      %cst_48 = arith.constant 9.765625E-4 : f32
      %113 = vector.broadcast %cst_48 : f32 to vector<2x128xf32>
      %114 = arith.mulf %113, %112 : vector<2x128xf32>
      %cst_49 = arith.constant 1.000000e-03 : f32
      %115 = vector.broadcast %cst_49 : f32 to vector<2x128xf32>
      %116 = arith.mulf %115, %114 : vector<2x128xf32>
      %117 = arith.subf %110, %116 : vector<2x128xf32>
      %118 = arith.mulf %117, %117 : vector<2x128xf32>
      %cst_50 = arith.constant dense<0.000000e+00> : vector<2xf32>
      %119 = vector.multi_reduction <add>, %118, %cst_50 [1] : vector<2x128xf32> to vector<2xf32>
      %120 = vector.shape_cast %119 : vector<2xf32> to vector<2x1xf32>
      %121 = math.rsqrt %120 : vector<2x1xf32>
      %cst_51 = arith.constant 1.000000e+00 : f32
      %122 = vector.broadcast %cst_51 : f32 to vector<2x1xf32>
      %123 = arith.minimumf %121, %122 : vector<2x1xf32>
      %124 = vector.broadcast %123 : vector<2x1xf32> to vector<2x128xf32>
      %125 = arith.mulf %117, %124 : vector<2x128xf32>
      %c7_i32 = arith.constant 7 : i32
      %cst_52 = arith.constant dense<0.000000e+00> : vector<2x128xf32>
      %126 = tpu.matmul %125, %19, %cst_52 {dimension_numbers = #tpu.dot_dimension_numbers<[1], [0], [0], [1], [0, 0, 1, 1], [], []>} : vector<2x128xf32>, vector<128x128xf32>, vector<2x128xf32> -> vector<2x128xf32>
      %127 = arith.addf %126, %20 : vector<2x128xf32>
      %cst_53 = arith.constant 9.765625E-4 : f32
      %128 = vector.broadcast %cst_53 : f32 to vector<2x128xf32>
      %129 = arith.mulf %128, %127 : vector<2x128xf32>
      %cst_54 = arith.constant 1.000000e-03 : f32
      %130 = vector.broadcast %cst_54 : f32 to vector<2x128xf32>
      %131 = arith.mulf %130, %129 : vector<2x128xf32>
      %132 = arith.subf %125, %131 : vector<2x128xf32>
      %133 = arith.mulf %132, %132 : vector<2x128xf32>
      %cst_55 = arith.constant dense<0.000000e+00> : vector<2xf32>
      %134 = vector.multi_reduction <add>, %133, %cst_55 [1] : vector<2x128xf32> to vector<2xf32>
      %135 = vector.shape_cast %134 : vector<2xf32> to vector<2x1xf32>
      %136 = math.rsqrt %135 : vector<2x1xf32>
      %cst_56 = arith.constant 1.000000e+00 : f32
      %137 = vector.broadcast %cst_56 : f32 to vector<2x1xf32>
      %138 = arith.minimumf %136, %137 : vector<2x1xf32>
      %139 = vector.broadcast %138 : vector<2x1xf32> to vector<2x128xf32>
      %140 = arith.mulf %132, %139 : vector<2x128xf32>
      %c8_i32 = arith.constant 8 : i32
      %cst_57 = arith.constant dense<0.000000e+00> : vector<2x128xf32>
      %141 = tpu.matmul %140, %19, %cst_57 {dimension_numbers = #tpu.dot_dimension_numbers<[1], [0], [0], [1], [0, 0, 1, 1], [], []>} : vector<2x128xf32>, vector<128x128xf32>, vector<2x128xf32> -> vector<2x128xf32>
      %142 = arith.addf %141, %20 : vector<2x128xf32>
      %cst_58 = arith.constant 9.765625E-4 : f32
      %143 = vector.broadcast %cst_58 : f32 to vector<2x128xf32>
      %144 = arith.mulf %143, %142 : vector<2x128xf32>
      %cst_59 = arith.constant 1.000000e-03 : f32
      %145 = vector.broadcast %cst_59 : f32 to vector<2x128xf32>
      %146 = arith.mulf %145, %144 : vector<2x128xf32>
      %147 = arith.subf %140, %146 : vector<2x128xf32>
      %148 = arith.mulf %147, %147 : vector<2x128xf32>
      %cst_60 = arith.constant dense<0.000000e+00> : vector<2xf32>
      %149 = vector.multi_reduction <add>, %148, %cst_60 [1] : vector<2x128xf32> to vector<2xf32>
      %150 = vector.shape_cast %149 : vector<2xf32> to vector<2x1xf32>
      %151 = math.rsqrt %150 : vector<2x1xf32>
      %cst_61 = arith.constant 1.000000e+00 : f32
      %152 = vector.broadcast %cst_61 : f32 to vector<2x1xf32>
      %153 = arith.minimumf %151, %152 : vector<2x1xf32>
      %154 = vector.broadcast %153 : vector<2x1xf32> to vector<2x128xf32>
      %155 = arith.mulf %147, %154 : vector<2x128xf32>
      %c9_i32 = arith.constant 9 : i32
      %cst_62 = arith.constant dense<0.000000e+00> : vector<2x128xf32>
      %156 = tpu.matmul %155, %19, %cst_62 {dimension_numbers = #tpu.dot_dimension_numbers<[1], [0], [0], [1], [0, 0, 1, 1], [], []>} : vector<2x128xf32>, vector<128x128xf32>, vector<2x128xf32> -> vector<2x128xf32>
      %157 = arith.addf %156, %20 : vector<2x128xf32>
      %cst_63 = arith.constant 9.765625E-4 : f32
      %158 = vector.broadcast %cst_63 : f32 to vector<2x128xf32>
      %159 = arith.mulf %158, %157 : vector<2x128xf32>
      %cst_64 = arith.constant 1.000000e-03 : f32
      %160 = vector.broadcast %cst_64 : f32 to vector<2x128xf32>
      %161 = arith.mulf %160, %159 : vector<2x128xf32>
      %162 = arith.subf %155, %161 : vector<2x128xf32>
      %163 = arith.mulf %162, %162 : vector<2x128xf32>
      %cst_65 = arith.constant dense<0.000000e+00> : vector<2xf32>
      %164 = vector.multi_reduction <add>, %163, %cst_65 [1] : vector<2x128xf32> to vector<2xf32>
      %165 = vector.shape_cast %164 : vector<2xf32> to vector<2x1xf32>
      %166 = math.rsqrt %165 : vector<2x1xf32>
      %cst_66 = arith.constant 1.000000e+00 : f32
      %167 = vector.broadcast %cst_66 : f32 to vector<2x1xf32>
      %168 = arith.minimumf %166, %167 : vector<2x1xf32>
      %169 = vector.broadcast %168 : vector<2x1xf32> to vector<2x128xf32>
      %170 = arith.mulf %162, %169 : vector<2x128xf32>
      %c10_i32 = arith.constant 10 : i32
      %cst_67 = arith.constant dense<0.000000e+00> : vector<2x128xf32>
      %171 = tpu.matmul %170, %19, %cst_67 {dimension_numbers = #tpu.dot_dimension_numbers<[1], [0], [0], [1], [0, 0, 1, 1], [], []>} : vector<2x128xf32>, vector<128x128xf32>, vector<2x128xf32> -> vector<2x128xf32>
      %172 = arith.addf %171, %20 : vector<2x128xf32>
      %cst_68 = arith.constant 9.765625E-4 : f32
      %173 = vector.broadcast %cst_68 : f32 to vector<2x128xf32>
      %174 = arith.mulf %173, %172 : vector<2x128xf32>
      %cst_69 = arith.constant 1.000000e-03 : f32
      %175 = vector.broadcast %cst_69 : f32 to vector<2x128xf32>
      %176 = arith.mulf %175, %174 : vector<2x128xf32>
      %177 = arith.subf %170, %176 : vector<2x128xf32>
      %178 = arith.mulf %177, %177 : vector<2x128xf32>
      %cst_70 = arith.constant dense<0.000000e+00> : vector<2xf32>
      %179 = vector.multi_reduction <add>, %178, %cst_70 [1] : vector<2x128xf32> to vector<2xf32>
      %180 = vector.shape_cast %179 : vector<2xf32> to vector<2x1xf32>
      %181 = math.rsqrt %180 : vector<2x1xf32>
      %cst_71 = arith.constant 1.000000e+00 : f32
      %182 = vector.broadcast %cst_71 : f32 to vector<2x1xf32>
      %183 = arith.minimumf %181, %182 : vector<2x1xf32>
      %184 = vector.broadcast %183 : vector<2x1xf32> to vector<2x128xf32>
      %185 = arith.mulf %177, %184 : vector<2x128xf32>
      %c11_i32 = arith.constant 11 : i32
      %cst_72 = arith.constant dense<0.000000e+00> : vector<2x128xf32>
      %186 = tpu.matmul %185, %19, %cst_72 {dimension_numbers = #tpu.dot_dimension_numbers<[1], [0], [0], [1], [0, 0, 1, 1], [], []>} : vector<2x128xf32>, vector<128x128xf32>, vector<2x128xf32> -> vector<2x128xf32>
      %187 = arith.addf %186, %20 : vector<2x128xf32>
      %cst_73 = arith.constant 9.765625E-4 : f32
      %188 = vector.broadcast %cst_73 : f32 to vector<2x128xf32>
      %189 = arith.mulf %188, %187 : vector<2x128xf32>
      %cst_74 = arith.constant 1.000000e-03 : f32
      %190 = vector.broadcast %cst_74 : f32 to vector<2x128xf32>
      %191 = arith.mulf %190, %189 : vector<2x128xf32>
      %192 = arith.subf %185, %191 : vector<2x128xf32>
      %193 = arith.mulf %192, %192 : vector<2x128xf32>
      %cst_75 = arith.constant dense<0.000000e+00> : vector<2xf32>
      %194 = vector.multi_reduction <add>, %193, %cst_75 [1] : vector<2x128xf32> to vector<2xf32>
      %195 = vector.shape_cast %194 : vector<2xf32> to vector<2x1xf32>
      %196 = math.rsqrt %195 : vector<2x1xf32>
      %cst_76 = arith.constant 1.000000e+00 : f32
      %197 = vector.broadcast %cst_76 : f32 to vector<2x1xf32>
      %198 = arith.minimumf %196, %197 : vector<2x1xf32>
      %199 = vector.broadcast %198 : vector<2x1xf32> to vector<2x128xf32>
      %200 = arith.mulf %192, %199 : vector<2x128xf32>
      %c12_i32 = arith.constant 12 : i32
      %cst_77 = arith.constant dense<0.000000e+00> : vector<2x128xf32>
      %201 = tpu.matmul %200, %19, %cst_77 {dimension_numbers = #tpu.dot_dimension_numbers<[1], [0], [0], [1], [0, 0, 1, 1], [], []>} : vector<2x128xf32>, vector<128x128xf32>, vector<2x128xf32> -> vector<2x128xf32>
      %202 = arith.addf %201, %20 : vector<2x128xf32>
      %cst_78 = arith.constant 9.765625E-4 : f32
      %203 = vector.broadcast %cst_78 : f32 to vector<2x128xf32>
      %204 = arith.mulf %203, %202 : vector<2x128xf32>
      %cst_79 = arith.constant 1.000000e-03 : f32
      %205 = vector.broadcast %cst_79 : f32 to vector<2x128xf32>
      %206 = arith.mulf %205, %204 : vector<2x128xf32>
      %207 = arith.subf %200, %206 : vector<2x128xf32>
      %208 = arith.mulf %207, %207 : vector<2x128xf32>
      %cst_80 = arith.constant dense<0.000000e+00> : vector<2xf32>
      %209 = vector.multi_reduction <add>, %208, %cst_80 [1] : vector<2x128xf32> to vector<2xf32>
      %210 = vector.shape_cast %209 : vector<2xf32> to vector<2x1xf32>
      %211 = math.rsqrt %210 : vector<2x1xf32>
      %cst_81 = arith.constant 1.000000e+00 : f32
      %212 = vector.broadcast %cst_81 : f32 to vector<2x1xf32>
      %213 = arith.minimumf %211, %212 : vector<2x1xf32>
      %214 = vector.broadcast %213 : vector<2x1xf32> to vector<2x128xf32>
      %215 = arith.mulf %207, %214 : vector<2x128xf32>
      %c13_i32 = arith.constant 13 : i32
      %cst_82 = arith.constant dense<0.000000e+00> : vector<2x128xf32>
      %216 = tpu.matmul %215, %19, %cst_82 {dimension_numbers = #tpu.dot_dimension_numbers<[1], [0], [0], [1], [0, 0, 1, 1], [], []>} : vector<2x128xf32>, vector<128x128xf32>, vector<2x128xf32> -> vector<2x128xf32>
      %217 = arith.addf %216, %20 : vector<2x128xf32>
      %cst_83 = arith.constant 9.765625E-4 : f32
      %218 = vector.broadcast %cst_83 : f32 to vector<2x128xf32>
      %219 = arith.mulf %218, %217 : vector<2x128xf32>
      %cst_84 = arith.constant 1.000000e-03 : f32
      %220 = vector.broadcast %cst_84 : f32 to vector<2x128xf32>
      %221 = arith.mulf %220, %219 : vector<2x128xf32>
      %222 = arith.subf %215, %221 : vector<2x128xf32>
      %223 = arith.mulf %222, %222 : vector<2x128xf32>
      %cst_85 = arith.constant dense<0.000000e+00> : vector<2xf32>
      %224 = vector.multi_reduction <add>, %223, %cst_85 [1] : vector<2x128xf32> to vector<2xf32>
      %225 = vector.shape_cast %224 : vector<2xf32> to vector<2x1xf32>
      %226 = math.rsqrt %225 : vector<2x1xf32>
      %cst_86 = arith.constant 1.000000e+00 : f32
      %227 = vector.broadcast %cst_86 : f32 to vector<2x1xf32>
      %228 = arith.minimumf %226, %227 : vector<2x1xf32>
      %229 = vector.broadcast %228 : vector<2x1xf32> to vector<2x128xf32>
      %230 = arith.mulf %222, %229 : vector<2x128xf32>
      %c14_i32 = arith.constant 14 : i32
      %cst_87 = arith.constant dense<0.000000e+00> : vector<2x128xf32>
      %231 = tpu.matmul %230, %19, %cst_87 {dimension_numbers = #tpu.dot_dimension_numbers<[1], [0], [0], [1], [0, 0, 1, 1], [], []>} : vector<2x128xf32>, vector<128x128xf32>, vector<2x128xf32> -> vector<2x128xf32>
      %232 = arith.addf %231, %20 : vector<2x128xf32>
      %cst_88 = arith.constant 9.765625E-4 : f32
      %233 = vector.broadcast %cst_88 : f32 to vector<2x128xf32>
      %234 = arith.mulf %233, %232 : vector<2x128xf32>
      %cst_89 = arith.constant 1.000000e-03 : f32
      %235 = vector.broadcast %cst_89 : f32 to vector<2x128xf32>
      %236 = arith.mulf %235, %234 : vector<2x128xf32>
      %237 = arith.subf %230, %236 : vector<2x128xf32>
      %238 = arith.mulf %237, %237 : vector<2x128xf32>
      %cst_90 = arith.constant dense<0.000000e+00> : vector<2xf32>
      %239 = vector.multi_reduction <add>, %238, %cst_90 [1] : vector<2x128xf32> to vector<2xf32>
      %240 = vector.shape_cast %239 : vector<2xf32> to vector<2x1xf32>
      %241 = math.rsqrt %240 : vector<2x1xf32>
      %cst_91 = arith.constant 1.000000e+00 : f32
      %242 = vector.broadcast %cst_91 : f32 to vector<2x1xf32>
      %243 = arith.minimumf %241, %242 : vector<2x1xf32>
      %244 = vector.broadcast %243 : vector<2x1xf32> to vector<2x128xf32>
      %245 = arith.mulf %237, %244 : vector<2x128xf32>
      %c15_i32 = arith.constant 15 : i32
      %cst_92 = arith.constant dense<0.000000e+00> : vector<2x128xf32>
      %246 = tpu.matmul %245, %19, %cst_92 {dimension_numbers = #tpu.dot_dimension_numbers<[1], [0], [0], [1], [0, 0, 1, 1], [], []>} : vector<2x128xf32>, vector<128x128xf32>, vector<2x128xf32> -> vector<2x128xf32>
      %247 = arith.addf %246, %20 : vector<2x128xf32>
      %cst_93 = arith.constant 9.765625E-4 : f32
      %248 = vector.broadcast %cst_93 : f32 to vector<2x128xf32>
      %249 = arith.mulf %248, %247 : vector<2x128xf32>
      %cst_94 = arith.constant 1.000000e-03 : f32
      %250 = vector.broadcast %cst_94 : f32 to vector<2x128xf32>
      %251 = arith.mulf %250, %249 : vector<2x128xf32>
      %252 = arith.subf %245, %251 : vector<2x128xf32>
      %253 = arith.mulf %252, %252 : vector<2x128xf32>
      %cst_95 = arith.constant dense<0.000000e+00> : vector<2xf32>
      %254 = vector.multi_reduction <add>, %253, %cst_95 [1] : vector<2x128xf32> to vector<2xf32>
      %255 = vector.shape_cast %254 : vector<2xf32> to vector<2x1xf32>
      %256 = math.rsqrt %255 : vector<2x1xf32>
      %cst_96 = arith.constant 1.000000e+00 : f32
      %257 = vector.broadcast %cst_96 : f32 to vector<2x1xf32>
      %258 = arith.minimumf %256, %257 : vector<2x1xf32>
      %259 = vector.broadcast %258 : vector<2x1xf32> to vector<2x128xf32>
      %260 = arith.mulf %252, %259 : vector<2x128xf32>
      %c16_i32 = arith.constant 16 : i32
      %cst_97 = arith.constant dense<0.000000e+00> : vector<2x128xf32>
      %261 = tpu.matmul %260, %19, %cst_97 {dimension_numbers = #tpu.dot_dimension_numbers<[1], [0], [0], [1], [0, 0, 1, 1], [], []>} : vector<2x128xf32>, vector<128x128xf32>, vector<2x128xf32> -> vector<2x128xf32>
      %262 = arith.addf %261, %20 : vector<2x128xf32>
      %cst_98 = arith.constant 9.765625E-4 : f32
      %263 = vector.broadcast %cst_98 : f32 to vector<2x128xf32>
      %264 = arith.mulf %263, %262 : vector<2x128xf32>
      %cst_99 = arith.constant 1.000000e-03 : f32
      %265 = vector.broadcast %cst_99 : f32 to vector<2x128xf32>
      %266 = arith.mulf %265, %264 : vector<2x128xf32>
      %267 = arith.subf %260, %266 : vector<2x128xf32>
      %268 = arith.mulf %267, %267 : vector<2x128xf32>
      %cst_100 = arith.constant dense<0.000000e+00> : vector<2xf32>
      %269 = vector.multi_reduction <add>, %268, %cst_100 [1] : vector<2x128xf32> to vector<2xf32>
      %270 = vector.shape_cast %269 : vector<2xf32> to vector<2x1xf32>
      %271 = math.rsqrt %270 : vector<2x1xf32>
      %cst_101 = arith.constant 1.000000e+00 : f32
      %272 = vector.broadcast %cst_101 : f32 to vector<2x1xf32>
      %273 = arith.minimumf %271, %272 : vector<2x1xf32>
      %274 = vector.broadcast %273 : vector<2x1xf32> to vector<2x128xf32>
      %275 = arith.mulf %267, %274 : vector<2x128xf32>
      %c17_i32 = arith.constant 17 : i32
      %cst_102 = arith.constant dense<0.000000e+00> : vector<2x128xf32>
      %276 = tpu.matmul %275, %19, %cst_102 {dimension_numbers = #tpu.dot_dimension_numbers<[1], [0], [0], [1], [0, 0, 1, 1], [], []>} : vector<2x128xf32>, vector<128x128xf32>, vector<2x128xf32> -> vector<2x128xf32>
      %277 = arith.addf %276, %20 : vector<2x128xf32>
      %cst_103 = arith.constant 9.765625E-4 : f32
      %278 = vector.broadcast %cst_103 : f32 to vector<2x128xf32>
      %279 = arith.mulf %278, %277 : vector<2x128xf32>
      %cst_104 = arith.constant 1.000000e-03 : f32
      %280 = vector.broadcast %cst_104 : f32 to vector<2x128xf32>
      %281 = arith.mulf %280, %279 : vector<2x128xf32>
      %282 = arith.subf %275, %281 : vector<2x128xf32>
      %283 = arith.mulf %282, %282 : vector<2x128xf32>
      %cst_105 = arith.constant dense<0.000000e+00> : vector<2xf32>
      %284 = vector.multi_reduction <add>, %283, %cst_105 [1] : vector<2x128xf32> to vector<2xf32>
      %285 = vector.shape_cast %284 : vector<2xf32> to vector<2x1xf32>
      %286 = math.rsqrt %285 : vector<2x1xf32>
      %cst_106 = arith.constant 1.000000e+00 : f32
      %287 = vector.broadcast %cst_106 : f32 to vector<2x1xf32>
      %288 = arith.minimumf %286, %287 : vector<2x1xf32>
      %289 = vector.broadcast %288 : vector<2x1xf32> to vector<2x128xf32>
      %290 = arith.mulf %282, %289 : vector<2x128xf32>
      %c18_i32 = arith.constant 18 : i32
      %cst_107 = arith.constant dense<0.000000e+00> : vector<2x128xf32>
      %291 = tpu.matmul %290, %19, %cst_107 {dimension_numbers = #tpu.dot_dimension_numbers<[1], [0], [0], [1], [0, 0, 1, 1], [], []>} : vector<2x128xf32>, vector<128x128xf32>, vector<2x128xf32> -> vector<2x128xf32>
      %292 = arith.addf %291, %20 : vector<2x128xf32>
      %cst_108 = arith.constant 9.765625E-4 : f32
      %293 = vector.broadcast %cst_108 : f32 to vector<2x128xf32>
      %294 = arith.mulf %293, %292 : vector<2x128xf32>
      %cst_109 = arith.constant 1.000000e-03 : f32
      %295 = vector.broadcast %cst_109 : f32 to vector<2x128xf32>
      %296 = arith.mulf %295, %294 : vector<2x128xf32>
      %297 = arith.subf %290, %296 : vector<2x128xf32>
      %298 = arith.mulf %297, %297 : vector<2x128xf32>
      %cst_110 = arith.constant dense<0.000000e+00> : vector<2xf32>
      %299 = vector.multi_reduction <add>, %298, %cst_110 [1] : vector<2x128xf32> to vector<2xf32>
      %300 = vector.shape_cast %299 : vector<2xf32> to vector<2x1xf32>
      %301 = math.rsqrt %300 : vector<2x1xf32>
      %cst_111 = arith.constant 1.000000e+00 : f32
      %302 = vector.broadcast %cst_111 : f32 to vector<2x1xf32>
      %303 = arith.minimumf %301, %302 : vector<2x1xf32>
      %304 = vector.broadcast %303 : vector<2x1xf32> to vector<2x128xf32>
      %305 = arith.mulf %297, %304 : vector<2x128xf32>
      %c19_i32 = arith.constant 19 : i32
      %cst_112 = arith.constant dense<0.000000e+00> : vector<2x128xf32>
      %306 = tpu.matmul %305, %19, %cst_112 {dimension_numbers = #tpu.dot_dimension_numbers<[1], [0], [0], [1], [0, 0, 1, 1], [], []>} : vector<2x128xf32>, vector<128x128xf32>, vector<2x128xf32> -> vector<2x128xf32>
      %307 = arith.addf %306, %20 : vector<2x128xf32>
      %cst_113 = arith.constant 9.765625E-4 : f32
      %308 = vector.broadcast %cst_113 : f32 to vector<2x128xf32>
      %309 = arith.mulf %308, %307 : vector<2x128xf32>
      %cst_114 = arith.constant 1.000000e-03 : f32
      %310 = vector.broadcast %cst_114 : f32 to vector<2x128xf32>
      %311 = arith.mulf %310, %309 : vector<2x128xf32>
      %312 = arith.subf %305, %311 : vector<2x128xf32>
      %313 = arith.mulf %312, %312 : vector<2x128xf32>
      %cst_115 = arith.constant dense<0.000000e+00> : vector<2xf32>
      %314 = vector.multi_reduction <add>, %313, %cst_115 [1] : vector<2x128xf32> to vector<2xf32>
      %315 = vector.shape_cast %314 : vector<2xf32> to vector<2x1xf32>
      %316 = math.rsqrt %315 : vector<2x1xf32>
      %cst_116 = arith.constant 1.000000e+00 : f32
      %317 = vector.broadcast %cst_116 : f32 to vector<2x1xf32>
      %318 = arith.minimumf %316, %317 : vector<2x1xf32>
      %319 = vector.broadcast %318 : vector<2x1xf32> to vector<2x128xf32>
      %320 = arith.mulf %312, %319 : vector<2x128xf32>
      %c0_117 = arith.constant 0 : index
      %c0_118 = arith.constant 0 : index
      %321 = vector.load %arg9[%c0_117, %c0_118] : memref<2x128xf32, #tpu.memory_space<vmem>>, vector<2x128xf32>
      tpu.vector_store %arg9[%c0_117, %c0_118], %320 {strides = array<i32>} : memref<2x128xf32, #tpu.memory_space<vmem>>, vector<2x128xf32>,
      %c0_119 = arith.constant 0 : index
      %c0_120 = arith.constant 0 : index
      %322 = vector.load %arg7[%c0_119, %c0_120] : memref<2x128xf32, #tpu.memory_space<vmem>>, vector<2x128xf32>
      tpu.vector_store %arg7[%c0_119, %c0_120], %320 {strides = array<i32>} : memref<2x128xf32, #tpu.memory_space<vmem>>, vector<2x128xf32>,
    } else {
    }
    %c0 = arith.constant 0 : index
    %c0_1 = arith.constant 0 : index
    %3 = vector.load %arg9[%c0, %c0_1] : memref<2x128xf32, #tpu.memory_space<vmem>>, vector<2x128xf32>
    %c0_2 = arith.constant 0 : index
    %c0_3 = arith.constant 0 : index
    %4 = vector.load %arg5[%c0_2, %c0_3] : memref<128x128xf32, #tpu.memory_space<vmem>>, vector<128x128xf32>
    %cst = arith.constant dense<0.000000e+00> : vector<2x128xf32>
    %5 = tpu.matmul %3, %4, %cst {dimension_numbers = #tpu.dot_dimension_numbers<[1], [0], [0], [1], [0, 0, 1, 1], [], []>} : vector<2x128xf32>, vector<128x128xf32>, vector<2x128xf32> -> vector<2x128xf32>
    %c0_4 = arith.constant 0 : index
    %c0_5 = arith.constant 0 : index
    %6 = vector.load %arg6[%c0_4, %c0_5] : memref<1x128xf32, #tpu.memory_space<vmem>>, vector<1x128xf32>
    %7 = vector.broadcast %6 : vector<1x128xf32> to vector<2x128xf32>
    %8 = arith.addf %5, %7 : vector<2x128xf32>
    %c0_6 = arith.constant 0 : index
    %c0_7 = arith.constant 0 : index
    %9 = vector.load %arg8[%c0_6, %c0_7] : memref<2x128xf32, #tpu.memory_space<vmem>>, vector<2x128xf32>
    tpu.vector_store %arg8[%c0_6, %c0_7], %8 {strides = array<i32>} : memref<2x128xf32, #tpu.memory_space<vmem>>, vector<2x128xf32>,
    return
  }
  func.func @transform_0(%arg0: i32, %arg1: i32) -> (i32, i32) {
    %c0_i32 = arith.constant 0 : i32
    %c0_i32_0 = arith.constant 0 : i32
    return %arg0, %c0_i32 : i32, i32
  }
  func.func @transform_1(%arg0: i32, %arg1: i32) -> (i32, i32) {
    %c0_i32 = arith.constant 0 : i32
    %c0_i32_0 = arith.constant 0 : i32
    return %arg0, %c0_i32 : i32, i32
  }
  func.func @transform_2(%arg0: i32, %arg1: i32) -> (i32, i32) {
    %c0_i32 = arith.constant 0 : i32
    %c0_i32_0 = arith.constant 0 : i32
    %c0_i32_1 = arith.constant 0 : i32
    return %c0_i32, %c0_i32_0 : i32, i32
  }
  func.func @transform_3(%arg0: i32, %arg1: i32) -> (i32, i32) {
    %c0_i32 = arith.constant 0 : i32
    %c0_i32_0 = arith.constant 0 : i32
    return %c0_i32, %arg1 : i32, i32
  }
  func.func @transform_4(%arg0: i32, %arg1: i32) -> (i32, i32) {
    %c0_i32 = arith.constant 0 : i32
    %c0_i32_0 = arith.constant 0 : i32
    return %c0_i32, %arg1 : i32, i32
  }
  func.func @transform_5(%arg0: i32, %arg1: i32) -> (i32, i32) {
    %c0_i32 = arith.constant 0 : i32
    %c0_i32_0 = arith.constant 0 : i32
    return %arg0, %c0_i32 : i32, i32
  }
  func.func @transform_6(%arg0: i32, %arg1: i32) -> (i32, i32) {
    %c0_i32 = arith.constant 0 : i32
    return %arg0, %arg1 : i32, i32
  }
}

</mosaic_0001>

<bundles_post_ra>
// kernel: glo_captions_forward.2
= control target key start
LH: loop header
LB: loop body
LE: loop exit
PB: predicated region body
PF: predicated region fallthrough
CT: control target
= control target key end

     0   :  { %s1160_s15 = smov 0   ;;  %s1162_s16 = smov 0   ;;  %s1646_s0 = inlined_call_operand.vmem [shape: bf16[2,1024], index: 0, kind: input, shape index: {}]   ;;  %s1647_s1 = inlined_call_operand.vmem [shape: bf16[128,1024], index: 1, kind: input, shape index: {}]   ;;  %s1648_s2 = inlined_call_operand.vmem [shape: bf16[1,1024], index: 2, kind: input, shape index: {}]   ;;  %s1649_s3 = inlined_call_operand.vmem [shape: f32[128,128], index: 3, kind: output, shape index: {0}]   ;;  %s1650_s4 = inlined_call_operand.vmem [shape: f32[2,128], index: 4, kind: output, shape index: {1}]  }
   0x1   :  { %s1164_s17 = smov 0  }
   0x2 LB: > { %s987_s18 = sadd.s32 4294967295, %s1131_s17   ;;  %s1177_s19 = sadd.s32 1, %s1131_s17   ;;  %s1131_s17 = sphi %s1164_s17, %s1653_s17   ;;  %s1127_s16 = sphi %s1162_s16, %s1652_s16   ;;  %s1123_s15 = sphi %s1160_s15, %s1651_s15  }
   0x3   : > { %s45_s20 = ssub.s32 %s1131_s17, %s1177_s19  ;;  %s48_s21 = sadd.s32 1, %s1127_s16 }
   0x4   : > { %p46_p0 = scmp.eq.s32.totalorder %s45_s20, 0  ;;  %p55_p1 = scmp.ne.s32.totalorder %s1127_s16, %s1123_s15 }
   0x5   : > { %p56_p2 = scmp.eq.s32.totalorder %s1131_s17, 0  ;;  %p989_p4 = scmp.ge.s32.totalorder %s1131_s17, 2 }
   0x6   : > { %s1186_s22 = scalar_select %p46_p0, %s1127_s16, %s48_s21  }
   0x7   : > { %p57_p3 = por %p56_p2, %p55_p1  ;;  %149 = sbr.rel (%p989_p4) target bundleno = 34 (0x22), region = 16 }
   0xe   : > { %160 = sbr.rel (!%p57_p3) target bundleno = 34 (0x22), region = 24  ;;  %s162_s23 = sand.u32 (%p57_p3), 1, %s1127_s16  }
   0xf   : > { %s1034_s24 = sshll.u32 (%p57_p3), %s1131_s17, 4  ;;  %s990_s25 = sshll.u32 (%p57_p3), %s162_s23, 8 }
  0x10   : > { %s1194_s28 = scalar_lea.vmem (%p57_p3), %s1647_s1, %s1034_s24  ;;  %s1199_s29 = scalar_lea.vmem (%p57_p3), [#allocation2], %s990_s25 }
  0x11   : > { %v180_v0 = vld [vmem:[%s1194_s28] sm:$0xff] (%p57_p3)  ;;  %v182_v1 = vld [vmem:[%s1194_s28 + $0x8] sm:$0xff] (%p57_p3) }
  0x12   : > { %v184_v2 = vld [vmem:[%s1194_s28 + $0x20] sm:$0xff] (%p57_p3)  ;;  %181 = vst [vmem:[%s1199_s29] sm:$0xff] (%p57_p3), %v180_v0  ;;  %183 = vst [vmem:[%s1199_s29 + $0x8] sm:$0xff] (%p57_p3), %v182_v1  ;;  %v186_v3 = vld [vmem:[%s1194_s28 + $0x28] sm:$0xff] (%p57_p3) }
  0x13   : > { %185 = vst [vmem:[%s1199_s29 + $0x10] sm:$0xff] (%p57_p3), %v184_v2  ;;  %v188_v4 = vld [vmem:[%s1194_s28 + $0x40] sm:$0xff] (%p57_p3)  ;;  %v190_v5 = vld [vmem:[%s1194_s28 + $0x48] sm:$0xff] (%p57_p3)  ;;  %187 = vst [vmem:[%s1199_s29 + $0x18] sm:$0xff] (%p57_p3), %v186_v3 }
  0x14   : > { %189 = vst [vmem:[%s1199_s29 + $0x20] sm:$0xff] (%p57_p3), %v188_v4  ;;  %191 = vst [vmem:[%s1199_s29 + $0x28] sm:$0xff] (%p57_p3), %v190_v5  ;;  %v192_v6 = vld [vmem:[%s1194_s28 + $0x60] sm:$0xff] (%p57_p3)  ;;  %v194_v7 = vld [vmem:[%s1194_s28 + $0x68] sm:$0xff] (%p57_p3) }
  0x15   : > { %v196_v8 = vld [vmem:[%s1194_s28 + $0x80] sm:$0xff]  ;;  %193 = vst [vmem:[%s1199_s29 + $0x30] sm:$0xff] %v192_v6  ;;  %195 = vst [vmem:[%s1199_s29 + $0x38] sm:$0xff] %v194_v7  ;;  %v198_v9 = vld [vmem:[%s1194_s28 + $0x88] sm:$0xff] }
  0x16   : > { %197 = vst [vmem:[%s1199_s29 + $0x40] sm:$0xff] %v196_v8  ;;  %v200_v10 = vld [vmem:[%s1194_s28 + $0xa0] sm:$0xff]  ;;  %v202_v11 = vld [vmem:[%s1194_s28 + $0xa8] sm:$0xff]  ;;  %199 = vst [vmem:[%s1199_s29 + $0x48] sm:$0xff] %v198_v9 }
  0x17   : > { %201 = vst [vmem:[%s1199_s29 + $0x50] sm:$0xff] %v200_v10  ;;  %203 = vst [vmem:[%s1199_s29 + $0x58] sm:$0xff] %v202_v11  ;;  %v204_v12 = vld [vmem:[%s1194_s28 + $0xc0] sm:$0xff]  ;;  %v206_v13 = vld [vmem:[%s1194_s28 + $0xc8] sm:$0xff] }
  0x18   : > { %v208_v14 = vld [vmem:[%s1194_s28 + $0xe0] sm:$0xff]  ;;  %205 = vst [vmem:[%s1199_s29 + $0x60] sm:$0xff] %v204_v12  ;;  %207 = vst [vmem:[%s1199_s29 + $0x68] sm:$0xff] %v206_v13  ;;  %v210_v15 = vld [vmem:[%s1194_s28 + $0xe8] sm:$0xff] }
  0x19   : > { %209 = vst [vmem:[%s1199_s29 + $0x70] sm:$0xff] %v208_v14  ;;  %v212_v16 = vld [vmem:[%s1194_s28 + $0x100] sm:$0xff]  ;;  %v214_v17 = vld [vmem:[%s1194_s28 + $0x108] sm:$0xff]  ;;  %211 = vst [vmem:[%s1199_s29 + $0x78] sm:$0xff] %v210_v15 }
  0x1a   : > { %213 = vst [vmem:[%s1199_s29 + $0x80] sm:$0xff] %v212_v16  ;;  %215 = vst [vmem:[%s1199_s29 + $0x88] sm:$0xff] %v214_v17  ;;  %v216_v18 = vld [vmem:[%s1194_s28 + $0x120] sm:$0xff]  ;;  %v218_v19 = vld [vmem:[%s1194_s28 + $0x128] sm:$0xff] }
  0x1b   : > { %v220_v20 = vld [vmem:[%s1194_s28 + $0x140] sm:$0xff]  ;;  %217 = vst [vmem:[%s1199_s29 + $0x90] sm:$0xff] %v216_v18  ;;  %219 = vst [vmem:[%s1199_s29 + $0x98] sm:$0xff] %v218_v19  ;;  %v222_v21 = vld [vmem:[%s1194_s28 + $0x148] sm:$0xff] }
  0x1c   : > { %221 = vst [vmem:[%s1199_s29 + $0xa0] sm:$0xff] %v220_v20  ;;  %v224_v22 = vld [vmem:[%s1194_s28 + $0x160] sm:$0xff]  ;;  %v226_v23 = vld [vmem:[%s1194_s28 + $0x168] sm:$0xff]  ;;  %223 = vst [vmem:[%s1199_s29 + $0xa8] sm:$0xff] %v222_v21 }
  0x1d   : > { %225 = vst [vmem:[%s1199_s29 + $0xb0] sm:$0xff] %v224_v22  ;;  %227 = vst [vmem:[%s1199_s29 + $0xb8] sm:$0xff] %v226_v23  ;;  %v228_v24 = vld [vmem:[%s1194_s28 + $0x180] sm:$0xff]  ;;  %v230_v25 = vld [vmem:[%s1194_s28 + $0x188] sm:$0xff] }
  0x1e   : > { %v232_v26 = vld [vmem:[%s1194_s28 + $0x1a0] sm:$0xff]  ;;  %229 = vst [vmem:[%s1199_s29 + $0xc0] sm:$0xff] %v228_v24  ;;  %231 = vst [vmem:[%s1199_s29 + $0xc8] sm:$0xff] %v230_v25  ;;  %v234_v27 = vld [vmem:[%s1194_s28 + $0x1a8] sm:$0xff] }
  0x1f   : > { %233 = vst [vmem:[%s1199_s29 + $0xd0] sm:$0xff] %v232_v26  ;;  %v236_v28 = vld [vmem:[%s1194_s28 + $0x1c0] sm:$0xff]  ;;  %v238_v29 = vld [vmem:[%s1194_s28 + $0x1c8] sm:$0xff]  ;;  %235 = vst [vmem:[%s1199_s29 + $0xd8] sm:$0xff] %v234_v27 }
  0x20   : > { %237 = vst [vmem:[%s1199_s29 + $0xe0] sm:$0xff] %v236_v28  ;;  %239 = vst [vmem:[%s1199_s29 + $0xe8] sm:$0xff] %v238_v29  ;;  %v240_v30 = vld [vmem:[%s1194_s28 + $0x1e0] sm:$0xff]  ;;  %v242_v31 = vld [vmem:[%s1194_s28 + $0x1e8] sm:$0xff] }
  0x21   : > { %241 = vst [vmem:[%s1199_s29 + $0xf0] sm:$0xff] %v240_v30  ;;  %243 = vst [vmem:[%s1199_s29 + $0xf8] sm:$0xff] %v242_v31 }
  0x22 PF: > { %p993_p5 = scmp.ge.s32.totalorder %s1131_s17, 1  ;;  %p256_p6 = scmp.lt.s32.totalorder %s1131_s17, 3 }
  0x24   : > { %p257_p7 = pnand %p993_p5, %p256_p6 }
  0x25   : > { %s263_s30 = sand.u32 (!%p257_p7), 1, %s1123_s15   ;;  %s995_s5 = sshll.u32 (!%p257_p7), %s987_s18, 2 }
  0x26   : > { %260 = sbr.rel (%p257_p7) target bundleno = 403 (0x193), region = 51  ;;  %s994_s6 = sshll.u32 (!%p257_p7), %s263_s30, 8 }
  0x27   : > { %p292_p8 = scmp.lt.s32.totalorder (!%p257_p7), %s995_s5, 7  ;;  %s1277_s13 = scalar_lea.vmem (!%p257_p7), [#allocation2], %s994_s6 }
  0x28   : > { %p997_p9 = scmp.ne.s32.totalorder (!%p257_p7), %s987_s18, 0 }
  0x2d   : > { %s1655_s5 = smov (!%p292_p8, %s995_s5), 7  ;;  %306 = sbr.rel (%p997_p9) target bundleno = 56 (0x38), region = 59 }
  0x2e   : > { %s294_s9 = scalar_lea.vmem %s1646_s0, %s1655_s5  ;;  %s300_s12 = scalar_lea.vmem %s1648_s2, %s1655_s5  ;;  %v1133_v32 = vmov (!%p997_p9), 0.0  }
  0x2f   : > { %307 = vst [vmem:[%s1649_s3] sm:$0xff] (!%p997_p9), %v1133_v32  ;;  %308 = vst [vmem:[%s1649_s3 + $0x8] sm:$0xff] (!%p997_p9), %v1133_v32 }
  0x30   : > { %309 = vst [vmem:[%s1649_s3 + $0x10] sm:$0xff] (!%p997_p9), %v1133_v32  ;;  %310 = vst [vmem:[%s1649_s3 + $0x18] sm:$0xff] (!%p997_p9), %v1133_v32 }
  0x31   : > { %311 = vst [vmem:[%s1649_s3 + $0x20] sm:$0xff] (!%p997_p9), %v1133_v32  ;;  %312 = vst [vmem:[%s1649_s3 + $0x28] sm:$0xff] (!%p997_p9), %v1133_v32 }
  0x32   : > { %313 = vst [vmem:[%s1649_s3 + $0x30] sm:$0xff] (!%p997_p9), %v1133_v32  ;;  %314 = vst [vmem:[%s1649_s3 + $0x38] sm:$0xff] (!%p997_p9), %v1133_v32 }
  0x33   : > { %315 = vst [vmem:[%s1649_s3 + $0x40] sm:$0xff] (!%p997_p9), %v1133_v32  ;;  %316 = vst [vmem:[%s1649_s3 + $0x48] sm:$0xff] (!%p997_p9), %v1133_v32 }
  0x34   : > { %317 = vst [vmem:[%s1649_s3 + $0x50] sm:$0xff] %v1133_v32  ;;  %318 = vst [vmem:[%s1649_s3 + $0x58] sm:$0xff] %v1133_v32 }
  0x35   : > { %319 = vst [vmem:[%s1649_s3 + $0x60] sm:$0xff] %v1133_v32  ;;  %320 = vst [vmem:[%s1649_s3 + $0x68] sm:$0xff] %v1133_v32 }
  0x36   : > { %321 = vst [vmem:[%s1649_s3 + $0x70] sm:$0xff] %v1133_v32  ;;  %322 = vst [vmem:[%s1649_s3 + $0x78] sm:$0xff] %v1133_v32 }
  0x37   : > { %323 = vst [vmem:[%s1650_s4] sm:$0x3] %v1133_v32 }
  0x38 PF: > { %v1333_v33 = vld [vmem:[%s1277_s13 + $0x4] ss:$16 sps:$4 sm:$0xff]   ;;  %v1336_v34 = vld [vmem:[%s1277_s13 + $0xc] ss:$16 sps:$4 sm:$0xff]   ;;  %v1340_v35 = vld [vmem:[%s1277_s13] ss:$16 sps:$4 sm:$0xff]   ;;  %v772_v3 = vlaneseq }
  0x39   : > { %532 = vmatprep.subr.bf16.mxu0 %v1333_v33  ;;  %v1343_v36 = vld [vmem:[%s1277_s13 + $0x8] ss:$16 sps:$4 sm:$0xff]   ;;  %564 = vmatprep.mubr.bf16.mxu0 %v1333_v33  ;;  %v1348_v37 = vld [vmem:[%s1277_s13 + $0x24] ss:$16 sps:$4 sm:$0xff]   ;;  %v1354_v38 = vld [vmem:[%s1277_s13 + $0x2c] ss:$16 sps:$4 sm:$0xff]  }
  0x3a   : > { %629 = vmatprep.subr.bf16.mxu1 %v1336_v34  ;;  %661 = vmatprep.mubr.bf16.mxu1 %v1336_v34  ;;  %v1359_v39 = vld [vmem:[%s1277_s13 + $0x20] ss:$16 sps:$4 sm:$0xff]   ;;  %v1362_v40 = vld [vmem:[%s1277_s13 + $0x28] ss:$16 sps:$4 sm:$0xff]   ;;  %v1365_v41 = vld [vmem:[%s1277_s13 + $0x44] ss:$16 sps:$4 sm:$0xff]  }
  0x3b   : > { %533 = vmatpush1.bf16.xpose.msra.mxu0 %v1340_v35  ;;  %630 = vmatpush1.bf16.xpose.msra.mxu1 %v1343_v36  ;;  %v1368_v42 = vld [vmem:[%s1277_s13 + $0x4c] ss:$16 sps:$4 sm:$0xff]   ;;  %v1375_v43 = vld [vmem:[%s1277_s13 + $0x40] ss:$16 sps:$4 sm:$0xff]   ;;  %v1378_v44 = vld [vmem:[%s1277_s13 + $0x48] ss:$16 sps:$4 sm:$0xff]  }
  0x3c   : > { %534 = vmatprep.subr.bf16.mxu0 %v1348_v37  ;;  %631 = vmatprep.subr.bf16.mxu1 %v1354_v38  ;;  %v1381_v45 = vld [vmem:[%s1277_s13 + $0x64] ss:$16 sps:$4 sm:$0xff]   ;;  %v1384_v46 = vld [vmem:[%s1277_s13 + $0x6c] ss:$16 sps:$4 sm:$0xff]   ;;  %v1391_v47 = vld [vmem:[%s1277_s13 + $0x60] ss:$16 sps:$4 sm:$0xff]  }
  0x3d   : > { %v1394_v48 = vld [vmem:[%s1277_s13 + $0x68] ss:$16 sps:$4 sm:$0xff]   ;;  %v1397_v49 = vld [vmem:[%s1277_s13 + $0x84] ss:$16 sps:$4 sm:$0xff]   ;;  %v1400_v50 = vld [vmem:[%s1277_s13 + $0x8c] ss:$16 sps:$4 sm:$0xff]  }
  0x3e   : > { %v1407_v51 = vld [vmem:[%s1277_s13 + $0x80] ss:$16 sps:$4 sm:$0xff]   ;;  %v1410_v52 = vld [vmem:[%s1277_s13 + $0x88] ss:$16 sps:$4 sm:$0xff]   ;;  %v1413_v53 = vld [vmem:[%s1277_s13 + $0xa4] ss:$16 sps:$4 sm:$0xff]  }
  0x3f   : > { %v1416_v54 = vld [vmem:[%s1277_s13 + $0xac] ss:$16 sps:$4 sm:$0xff]   ;;  %v1423_v55 = vld [vmem:[%s1277_s13 + $0xa0] ss:$16 sps:$4 sm:$0xff]   ;;  %v1426_v56 = vld [vmem:[%s1277_s13 + $0xa8] ss:$16 sps:$4 sm:$0xff]  }
  0x40   : > { %v1429_v57 = vld [vmem:[%s1277_s13 + $0xc4] ss:$16 sps:$4 sm:$0xff]   ;;  %v1432_v58 = vld [vmem:[%s1277_s13 + $0xcc] ss:$16 sps:$4 sm:$0xff]   ;;  %v1439_v59 = vld [vmem:[%s1277_s13 + $0xc0] ss:$16 sps:$4 sm:$0xff]  }
  0x41   : > { %v1442_v60 = vld [vmem:[%s1277_s13 + $0xc8] ss:$16 sps:$4 sm:$0xff]   ;;  %v1445_v61 = vld [vmem:[%s1277_s13 + $0xe4] ss:$16 sps:$4 sm:$0xff]   ;;  %v1448_v62 = vld [vmem:[%s1277_s13 + $0xec] ss:$16 sps:$4 sm:$0xff]  }
  0x42   : > { %v1455_v63 = vld [vmem:[%s1277_s13 + $0xe0] ss:$16 sps:$4 sm:$0xff]   ;;  %v1458_v0 = vld [vmem:[%s1277_s13 + $0xe8] ss:$16 sps:$4 sm:$0xff]   ;;  %v1134_v1 = vmov 1966171168  }
  0x43   : > { %535 = vmatpush1.bf16.xpose.msra.mxu0 %v1359_v39  ;;  %632 = vmatpush1.bf16.xpose.msra.mxu1 %v1362_v40  ;;  %v770_v2 = vunpack.c.l.s4 %v1134_v1  ;;  %v773_v5 = vshrl.u32 %v772_v3, 7  ;;  %v1030_v6 = vld.sshfl [vmem:[%s300_s12] sm:$0x33 pattern:$0x75316420]  ;;  %v361_v3 = vld [vmem:[%s1649_s3 + $0x28] sm:$0xff] }
  0x44   : > { %536 = vmatprep.subr.bf16.mxu0 %v1365_v41  ;;  %633 = vmatprep.subr.bf16.mxu1 %v1368_v42  ;;  %v768_v7 = vcombine.high %v1030_v6, %v1030_v6  ;;  %v1031_v10 = vld.sshfl [vmem:[%s294_s9] sm:$0x33 pattern:$0x75316420] }
  0x45   : > { %v771_v4 = vunpack.c.0.s8 %v770_v2  ;;  %v821_v11 = vcombine.high %v1031_v10, %v1031_v10  ;;  %v790_v14 = vsub.s32 0, %v773_v5 }
  0x47   : > { %v774_v8 = vsub.s32 %v771_v4, %v773_v5 }
  0x49   : > { %v782_v9 = vrot.slane %v768_v7, %v774_v8  ;;  %v775_v13 = vrot.slane %v1030_v6, %v774_v8  ;;  %v835_v16 = vrot.slane %v821_v11, %v774_v8  ;;  %v828_v22 = vrot.slane %v1031_v10, %v774_v8  ;;  %v362_v11 = vld [vmem:[%s1649_s3 + $0x30] sm:$0xff] }
  0x4b   : > { %537 = vmatpush1.bf16.xpose.msra.mxu0 %v1375_v43  ;;  %634 = vmatpush1.bf16.xpose.msra.mxu1 %v1378_v44  ;;  %v784_v12 = vcombine.high %v782_v9, %v782_v9  ;;  %v793_v15 = vpack.i.b16 %v782_v9, %v782_v9  ;;  %v783_v18 = vcombine.high %v775_v13, %v775_v13 }
  0x4c   : > { %538 = vmatprep.subr.bf16.mxu0 %v1381_v45  ;;  %635 = vmatprep.subr.bf16.mxu1 %v1384_v46  ;;  %v837_v21 = vcombine.high %v835_v16, %v835_v16  ;;  %v786_v23 = vpack.i.b16 %v775_v13, %v775_v13  ;;  %v836_v27 = vcombine.high %v828_v22, %v828_v22 }
  0x4d   : > { %v807_v17 = vpack.i.b16 %v784_v12, %v784_v12  ;;  %v798_v19 = vrot.slane %v793_v15, %v790_v14  ;;  %v800_v24 = vpack.i.b16 %v783_v18, %v783_v18 }
  0x4e   : > { %v791_v28 = vrot.slane %v786_v23, %v790_v14 }
  0x4f   : > { %v812_v20 = vrot.slane %v807_v17, %v790_v14  ;;  %v843_v25 = vsub.bf16 %v798_v19, %v835_v16  ;;  %v805_v29 = vrot.slane %v800_v24, %v790_v14  ;;  %v363_v17 = vld [vmem:[%s1649_s3 + $0x38] sm:$0xff] }
  0x50   : > { %v842_v30 = vsub.bf16 %v791_v28, %v828_v22 }
  0x51   : > { %v845_v26 = vsub.bf16 %v812_v20, %v837_v21  ;;  %v844_v31 = vsub.bf16 %v805_v29, %v836_v27 }
  0x53   : > { %539 = vmatpush1.bf16.xpose.msra.mxu0 %v1391_v47  ;;  %636 = vmatpush1.bf16.xpose.msra.mxu1 %v1394_v48 }
  0x54   : > { %540 = vmatprep.subr.bf16.mxu0 %v1397_v49  ;;  %637 = vmatprep.subr.bf16.mxu1 %v1400_v50 }
  0x5b   : > { %541 = vmatpush1.bf16.xpose.msra.mxu0 %v1407_v51  ;;  %638 = vmatpush1.bf16.xpose.msra.mxu1 %v1410_v52 }
  0x5c   : > { %542 = vmatprep.subr.bf16.mxu0 %v1413_v53  ;;  %639 = vmatprep.subr.bf16.mxu1 %v1416_v54 }
  0x63   : > { %543 = vmatpush1.bf16.xpose.msra.mxu0 %v1423_v55  ;;  %640 = vmatpush1.bf16.xpose.msra.mxu1 %v1426_v56 }
  0x64   : > { %544 = vmatprep.subr.bf16.mxu0 %v1429_v57  ;;  %641 = vmatprep.subr.bf16.mxu1 %v1432_v58 }
  0x6b   : > { %545 = vmatpush1.bf16.xpose.msra.mxu0 %v1439_v59  ;;  %642 = vmatpush1.bf16.xpose.msra.mxu1 %v1442_v60 }
  0x6c   : > { %546 = vmatprep.subr.bf16.mxu0 %v1445_v61  ;;  %643 = vmatprep.subr.bf16.mxu1 %v1448_v62 }
  0x73   : > { %547 = vmatpush1.bf16.xpose.msra.mxu0 %v1455_v63  ;;  %644 = vmatpush1.bf16.xpose.msra.mxu1 %v1458_v0 }
  0x74   : > { %847 = vmatprep.subr.bf16.mxu0 %v1333_v33  ;;  %887 = vmatprep.subr.bf16.mxu1 %v1336_v34  ;;  %v356_v33 = vld [vmem:[%s1649_s3] sm:$0xff] }
  0x7a   : > { %565 = vmatmul.mubr.bf16.vlgmr.msra.gmra.mrb[0].mxu0 %v1340_v35  ;;  %662 = vmatmul.mubr.bf16.vlgmr.msra.gmra.mrb[0].mxu1 %v1343_v36 }
  0x7b   : > { %848 = vmatpush1.bf16.xpose.msra.mxu0 %v1340_v35  ;;  %888 = vmatpush1.bf16.xpose.msra.mxu1 %v1343_v36 }
  0x7c   : > { %572 = vmatprep.mubr.bf16.mxu0 %v1348_v37  ;;  %669 = vmatprep.mubr.bf16.mxu1 %v1354_v38 }
  0x7d   : > { %849 = vmatprep.subr.bf16.mxu0 %v1348_v37  ;;  %889 = vmatprep.subr.bf16.mxu1 %v1354_v38 }
  0x82   : > { %573 = vmatmul.mubr.bf16.gmra.mrb[4].mxu0 %v1359_v39  ;;  %670 = vmatmul.mubr.bf16.gmra.mrb[4].mxu1 %v1362_v40 }
  0x83   : > { %850 = vmatpush1.bf16.xpose.msra.mxu0 %v1359_v39  ;;  %890 = vmatpush1.bf16.xpose.msra.mxu1 %v1362_v40  ;;  %v357_v39 = vld [vmem:[%s1649_s3 + $0x8] sm:$0xff] }
  0x84   : > { %580 = vmatprep.mubr.bf16.mxu0 %v1365_v41  ;;  %677 = vmatprep.mubr.bf16.mxu1 %v1368_v42 }
  0x85   : > { %851 = vmatprep.subr.bf16.mxu0 %v1365_v41  ;;  %891 = vmatprep.subr.bf16.mxu1 %v1368_v42 }
  0x8a   : > { %581 = vmatmul.mubr.bf16.gmra.mrb[8].mxu0 %v1375_v43  ;;  %678 = vmatmul.mubr.bf16.gmra.mrb[8].mxu1 %v1378_v44 }
  0x8b   : > { %852 = vmatpush1.bf16.xpose.msra.mxu0 %v1375_v43  ;;  %892 = vmatpush1.bf16.xpose.msra.mxu1 %v1378_v44 }
  0x8c   : > { %588 = vmatprep.mubr.bf16.mxu0 %v1381_v45  ;;  %685 = vmatprep.mubr.bf16.mxu1 %v1384_v46 }
  0x8d   : > { %853 = vmatprep.subr.bf16.mxu0 %v1381_v45  ;;  %893 = vmatprep.subr.bf16.mxu1 %v1384_v46 }
  0x92   : > { %589 = vmatmul.mubr.bf16.gmra.mrb[12].mxu0 %v1391_v47  ;;  %686 = vmatmul.mubr.bf16.gmra.mrb[12].mxu1 %v1394_v48 }
  0x93   : > { %854 = vmatpush1.bf16.xpose.msra.mxu0 %v1391_v47  ;;  %894 = vmatpush1.bf16.xpose.msra.mxu1 %v1394_v48  ;;  %v358_v47 = vld [vmem:[%s1649_s3 + $0x10] sm:$0xff] }
  0x94   : > { %596 = vmatprep.mubr.bf16.mxu0 %v1397_v49  ;;  %693 = vmatprep.mubr.bf16.mxu1 %v1400_v50 }
  0x95   : > { %855 = vmatprep.subr.bf16.mxu0 %v1397_v49  ;;  %895 = vmatprep.subr.bf16.mxu1 %v1400_v50 }
  0x9a   : > { %597 = vmatmul.mubr.bf16.gmra.mrb[16].mxu0 %v1407_v51  ;;  %694 = vmatmul.mubr.bf16.gmra.mrb[16].mxu1 %v1410_v52 }
  0x9b   : > { %856 = vmatpush1.bf16.xpose.msra.mxu0 %v1407_v51  ;;  %896 = vmatpush1.bf16.xpose.msra.mxu1 %v1410_v52 }
  0x9c   : > { %604 = vmatprep.mubr.bf16.mxu0 %v1413_v53  ;;  %701 = vmatprep.mubr.bf16.mxu1 %v1416_v54 }
  0x9d   : > { %857 = vmatprep.subr.bf16.mxu0 %v1413_v53  ;;  %897 = vmatprep.subr.bf16.mxu1 %v1416_v54  ;;  %v359_v53 = vld [vmem:[%s1649_s3 + $0x18] sm:$0xff] }
  0xa2   : > { %605 = vmatmul.mubr.bf16.gmra.mrb[20].mxu0 %v1423_v55  ;;  %702 = vmatmul.mubr.bf16.gmra.mrb[20].mxu1 %v1426_v56 }
  0xa3   : > { %858 = vmatpush1.bf16.xpose.msra.mxu0 %v1423_v55  ;;  %898 = vmatpush1.bf16.xpose.msra.mxu1 %v1426_v56 }
  0xa4   : > { %612 = vmatprep.mubr.bf16.mxu0 %v1429_v57  ;;  %709 = vmatprep.mubr.bf16.mxu1 %v1432_v58 }
  0xa5   : > { %859 = vmatprep.subr.bf16.mxu0 %v1429_v57  ;;  %899 = vmatprep.subr.bf16.mxu1 %v1432_v58 }
  0xaa   : > { %613 = vmatmul.mubr.bf16.gmra.mrb[24].mxu0 %v1439_v59  ;;  %710 = vmatmul.mubr.bf16.gmra.mrb[24].mxu1 %v1442_v60 }
  0xab   : > { %860 = vmatpush1.bf16.xpose.msra.mxu0 %v1439_v59  ;;  %900 = vmatpush1.bf16.xpose.msra.mxu1 %v1442_v60 }
  0xac   : > { %620 = vmatprep.mubr.bf16.mxu0 %v1445_v61  ;;  %717 = vmatprep.mubr.bf16.mxu1 %v1448_v62 }
  0xad   : > { %861 = vmatprep.subr.bf16.mxu0 %v1445_v61  ;;  %901 = vmatprep.subr.bf16.mxu1 %v1448_v62  ;;  %v360_v61 = vld [vmem:[%s1649_s3 + $0x20] sm:$0xff] }
  0xb2   : > { %621 = vmatmul.mubr.bf16.gmra.mrb[28].mxu0 %v1455_v63  ;;  %718 = vmatmul.mubr.bf16.gmra.mrb[28].mxu1 %v1458_v0 }
  0xb3   : > { %862 = vmatpush1.bf16.xpose.msra.mxu0 %v1455_v63  ;;  %902 = vmatpush1.bf16.xpose.msra.mxu1 %v1458_v0 }
  0xb4   : > { %879 = vmatprep.mubr.bf16.mxu0 %v843_v25  ;;  %919 = vmatprep.mubr.bf16.mxu1 %v845_v26  ;;  %v364_v25 = vld [vmem:[%s1649_s3 + $0x40] sm:$0xff] }
  0xba   : > { %880 = vmatmul.mubr.bf16.vlgmr.msra.gmra.mrb[32].mxu0 %v842_v30  ;;  %920 = vmatmul.mubr.bf16.vlgmr.msra.gmra.mrb[32].mxu1 %v844_v31  ;;  %v365_v31 = vld [vmem:[%s1649_s3 + $0x48] sm:$0xff] }
 0x14d   : > { %v566_v32 = vpop.f32.mrb[0].mxu0  ;;  %v663_v34 = vpop.f32.mrb[0].mxu1 }
 0x14e   : > { %v664_v35 = vadd.f32 %v663_v34, %v566_v32  ;;  %v568_v36 = vpop.f32.mrb[1].mxu0  ;;  %v665_v37 = vpop.f32.mrb[1].mxu1 }
 0x14f   : > { %v569_v38 = vpop.f32.mrb[2].mxu0  ;;  %v666_v40 = vpop.f32.mrb[2].mxu1 }
 0x150   : > { %v726_v41 = vadd.f32 %v664_v35, %v356_v33  ;;  %v667_v42 = vadd.f32 %v666_v40, %v569_v38  ;;  %v571_v43 = vpop.f32.mrb[3].mxu0  ;;  %v668_v44 = vpop.f32.mrb[3].mxu1 }
 0x152   : > { %742 = vst [vmem:[%s1649_s3] sm:$0xff] %v726_v41  ;;  %v727_v45 = vadd.f32 %v667_v42, %v357_v39  ;;  %v366_v39 = vld [vmem:[%s1649_s3 + $0x50] sm:$0xff] }
 0x154   : > { %743 = vst [vmem:[%s1649_s3 + $0x8] sm:$0xff] %v727_v45  ;;  %v367_v45 = vld [vmem:[%s1649_s3 + $0x58] sm:$0xff] }
 0x155   : > { %v574_v46 = vpop.f32.mrb[4].mxu0  ;;  %v671_v48 = vpop.f32.mrb[4].mxu1 }
 0x156   : > { %v672_v49 = vadd.f32 %v671_v48, %v574_v46  ;;  %v576_v50 = vpop.f32.mrb[5].mxu0  ;;  %v673_v51 = vpop.f32.mrb[5].mxu1 }
 0x157   : > { %v577_v52 = vpop.f32.mrb[6].mxu0  ;;  %v674_v54 = vpop.f32.mrb[6].mxu1 }
 0x158   : > { %v728_v55 = vadd.f32 %v672_v49, %v358_v47  ;;  %v675_v56 = vadd.f32 %v674_v54, %v577_v52  ;;  %v579_v57 = vpop.f32.mrb[7].mxu0  ;;  %v676_v58 = vpop.f32.mrb[7].mxu1 }
 0x15a   : > { %744 = vst [vmem:[%s1649_s3 + $0x10] sm:$0xff] %v728_v55  ;;  %v729_v59 = vadd.f32 %v675_v56, %v359_v53  ;;  %v368_v53 = vld [vmem:[%s1649_s3 + $0x60] sm:$0xff] }
 0x15c   : > { %745 = vst [vmem:[%s1649_s3 + $0x18] sm:$0xff] %v729_v59  ;;  %v369_v59 = vld [vmem:[%s1649_s3 + $0x68] sm:$0xff] }
 0x15d   : > { %v582_v60 = vpop.f32.mrb[8].mxu0  ;;  %v679_v62 = vpop.f32.mrb[8].mxu1 }
 0x15e   : > { %v680_v63 = vadd.f32 %v679_v62, %v582_v60  ;;  %v584_v0 = vpop.f32.mrb[9].mxu0  ;;  %v681_v1 = vpop.f32.mrb[9].mxu1 }
 0x15f   : > { %v585_v2 = vpop.f32.mrb[10].mxu0  ;;  %v682_v4 = vpop.f32.mrb[10].mxu1 }
 0x160   : > { %v730_v5 = vadd.f32 %v680_v63, %v360_v61  ;;  %v683_v6 = vadd.f32 %v682_v4, %v585_v2  ;;  %v587_v7 = vpop.f32.mrb[11].mxu0  ;;  %v684_v8 = vpop.f32.mrb[11].mxu1 }
 0x162   : > { %746 = vst [vmem:[%s1649_s3 + $0x20] sm:$0xff] %v730_v5  ;;  %v731_v9 = vadd.f32 %v683_v6, %v361_v3  ;;  %v370_v3 = vld [vmem:[%s1649_s3 + $0x70] sm:$0xff] }
 0x164   : > { %747 = vst [vmem:[%s1649_s3 + $0x28] sm:$0xff] %v731_v9  ;;  %v371_v9 = vld [vmem:[%s1649_s3 + $0x78] sm:$0xff] }
 0x165   : > { %v590_v10 = vpop.f32.mrb[12].mxu0  ;;  %v687_v12 = vpop.f32.mrb[12].mxu1 }
 0x166   : > { %v688_v13 = vadd.f32 %v687_v12, %v590_v10  ;;  %v592_v14 = vpop.f32.mrb[13].mxu0  ;;  %v689_v15 = vpop.f32.mrb[13].mxu1 }
 0x167   : > { %v593_v16 = vpop.f32.mrb[14].mxu0  ;;  %v690_v18 = vpop.f32.mrb[14].mxu1 }
 0x168   : > { %v732_v19 = vadd.f32 %v688_v13, %v362_v11  ;;  %v691_v20 = vadd.f32 %v690_v18, %v593_v16  ;;  %v595_v21 = vpop.f32.mrb[15].mxu0  ;;  %v692_v22 = vpop.f32.mrb[15].mxu1 }
 0x16a   : > { %748 = vst [vmem:[%s1649_s3 + $0x30] sm:$0xff] %v732_v19  ;;  %v733_v23 = vadd.f32 %v691_v20, %v363_v17  ;;  %v846_v17 = vld [vmem:[%s1650_s4] sm:$0x3] }
 0x16c   : > { %749 = vst [vmem:[%s1649_s3 + $0x38] sm:$0xff] %v733_v23 }
 0x16d   : > { %v598_v24 = vpop.f32.mrb[16].mxu0  ;;  %v695_v26 = vpop.f32.mrb[16].mxu1 }
 0x16e   : > { %v696_v27 = vadd.f32 %v695_v26, %v598_v24  ;;  %v600_v28 = vpop.f32.mrb[17].mxu0  ;;  %v697_v29 = vpop.f32.mrb[17].mxu1 }
 0x16f   : > { %v601_v30 = vpop.f32.mrb[18].mxu0  ;;  %v698_v32 = vpop.f32.mrb[18].mxu1 }
 0x170   : > { %v734_v33 = vadd.f32 %v696_v27, %v364_v25  ;;  %v699_v34 = vadd.f32 %v698_v32, %v601_v30  ;;  %v603_v35 = vpop.f32.mrb[19].mxu0  ;;  %v700_v36 = vpop.f32.mrb[19].mxu1 }
 0x172   : > { %750 = vst [vmem:[%s1649_s3 + $0x40] sm:$0xff] %v734_v33  ;;  %v735_v37 = vadd.f32 %v699_v34, %v365_v31 }
 0x174   : > { %751 = vst [vmem:[%s1649_s3 + $0x48] sm:$0xff] %v735_v37 }
 0x175   : > { %v606_v38 = vpop.f32.mrb[20].mxu0  ;;  %v703_v40 = vpop.f32.mrb[20].mxu1 }
 0x176   : > { %v704_v41 = vadd.f32 %v703_v40, %v606_v38  ;;  %v608_v42 = vpop.f32.mrb[21].mxu0  ;;  %v705_v43 = vpop.f32.mrb[21].mxu1 }
 0x177   : > { %v609_v44 = vpop.f32.mrb[22].mxu0  ;;  %v706_v46 = vpop.f32.mrb[22].mxu1 }
 0x178   : > { %v736_v47 = vadd.f32 %v704_v41, %v366_v39  ;;  %v707_v48 = vadd.f32 %v706_v46, %v609_v44  ;;  %v611_v49 = vpop.f32.mrb[23].mxu0  ;;  %v708_v50 = vpop.f32.mrb[23].mxu1 }
 0x17a   : > { %752 = vst [vmem:[%s1649_s3 + $0x50] sm:$0xff] %v736_v47  ;;  %v737_v51 = vadd.f32 %v707_v48, %v367_v45 }
 0x17c   : > { %753 = vst [vmem:[%s1649_s3 + $0x58] sm:$0xff] %v737_v51 }
 0x17d   : > { %v614_v52 = vpop.f32.mrb[24].mxu0  ;;  %v711_v54 = vpop.f32.mrb[24].mxu1 }
 0x17e   : > { %v712_v55 = vadd.f32 %v711_v54, %v614_v52  ;;  %v616_v56 = vpop.f32.mrb[25].mxu0  ;;  %v713_v57 = vpop.f32.mrb[25].mxu1 }
 0x17f   : > { %v617_v58 = vpop.f32.mrb[26].mxu0  ;;  %v714_v60 = vpop.f32.mrb[26].mxu1 }
 0x180   : > { %v738_v61 = vadd.f32 %v712_v55, %v368_v53  ;;  %v715_v62 = vadd.f32 %v714_v60, %v617_v58  ;;  %v619_v63 = vpop.f32.mrb[27].mxu0  ;;  %v716_v0 = vpop.f32.mrb[27].mxu1 }
 0x182   : > { %754 = vst [vmem:[%s1649_s3 + $0x60] sm:$0xff] %v738_v61  ;;  %v739_v1 = vadd.f32 %v715_v62, %v369_v59 }
 0x184   : > { %755 = vst [vmem:[%s1649_s3 + $0x68] sm:$0xff] %v739_v1 }
 0x185   : > { %v622_v2 = vpop.f32.mrb[28].mxu0  ;;  %v719_v4 = vpop.f32.mrb[28].mxu1 }
 0x186   : > { %v720_v5 = vadd.f32 %v719_v4, %v622_v2  ;;  %v624_v6 = vpop.f32.mrb[29].mxu0  ;;  %v721_v7 = vpop.f32.mrb[29].mxu1 }
 0x187   : > { %v625_v8 = vpop.f32.mrb[30].mxu0  ;;  %v722_v10 = vpop.f32.mrb[30].mxu1 }
 0x188   : > { %v740_v11 = vadd.f32 %v720_v5, %v370_v3  ;;  %v723_v12 = vadd.f32 %v722_v10, %v625_v8  ;;  %v627_v13 = vpop.f32.mrb[31].mxu0  ;;  %v724_v14 = vpop.f32.mrb[31].mxu1 }
 0x18a   : > { %756 = vst [vmem:[%s1649_s3 + $0x70] sm:$0xff] %v740_v11  ;;  %v741_v15 = vadd.f32 %v723_v12, %v371_v9 }
 0x18c   : > { %757 = vst [vmem:[%s1649_s3 + $0x78] sm:$0xff] %v741_v15 }
 0x18d   : > { %v881_v16 = vpop.f32.mrb[32].mxu0  ;;  %v921_v18 = vpop.f32.mrb[32].mxu1 }
 0x18e   : > { %v922_v19 = vadd.f32 %v921_v18, %v881_v16  ;;  %v883_v20 = vpop.f32.mrb[33].mxu0  ;;  %v923_v21 = vpop.f32.mrb[33].mxu1 }
 0x18f   : > { %v884_v22 = vpop.f32.mrb[34].mxu0  ;;  %v924_v23 = vpop.f32.mrb[34].mxu1 }
 0x190   : > { %v927_v24 = vadd.f32 %v922_v19, %v846_v17  ;;  %v885_v25 = vpop.f32.mrb[35].mxu0  ;;  %v925_v26 = vpop.f32.mrb[35].mxu1 }
 0x192   : > { %928 = vst [vmem:[%s1650_s4] sm:$0x3] %v927_v24 }
 0x193 PF: > { %p12_p10 = scmp.ge.s32.totalorder %s1177_s19, 4   ;;  %s1651_s15 = smov %s1127_s16 }
 0x194   : > { %s1652_s16 = smov %s1186_s22  ;;  %s1653_s17 = smov %s1177_s19 }
 0x195   :  { %14 = sbr.rel (!%p12_p10) target bundleno = 2 (0x2), region = 104 }

// kernel: glo_captions_forward.3
= control target key start
LH: loop header
LB: loop body
LE: loop exit
PB: predicated region body
PF: predicated region fallthrough
CT: control target
= control target key end

     0   :  { %12 = vsyncpa [#allocation4], 0  ;;  %vm30_vm0 = vcmask 1041408   ;;  %v3472_v4 = vmov 0.0|0.0   ;;  %s4080_s0 = inlined_call_operand.vmem [shape: f32[2,128], index: 0, kind: input, shape index: {}]   ;;  %s4081_s1 = inlined_call_operand.vmem [shape: f32[2,128], index: 1, kind: input, shape index: {}]   ;;  %s4082_s2 = inlined_call_operand.vmem [shape: f32[128,128], index: 2, kind: input, shape index: {}]   ;;  %s4083_s3 = inlined_call_operand.vmem [shape: f32[128,128], index: 3, kind: input, shape index: {}]   ;;  %s4084_s4 = inlined_call_operand.vmem [shape: f32[1,128], index: 4, kind: input, shape index: {}]   ;;  %s4085_s5 = inlined_call_operand.hbm [shape: f32[2,128], index: 5, kind: output, shape index: {0}]   ;;  %s4086_s6 = inlined_call_operand.hbm [shape: f32[2,128], index: 6, kind: output, shape index: {1}]  }
   0x1   :  { %v3515_v0 = vld [vmem:[%s4080_s0] sm:$0x3]  ;;  %v38_v2 = vld [vmem:[%s4082_s2 + $0x8] sm:$0xff]  ;;  %2872 = vmatprep.subr.bf16.mxu0 %v3472_v4  ;;  %v39_v6 = vld [vmem:[%s4082_s2 + $0x10] sm:$0xff]  ;;  %2896 = vmatprep.subr.bf16.mxu1 %v3472_v4 }
   0x2   :  { %v37_v1 = vld [vmem:[%s4082_s2] sm:$0xff]  ;;  %v29_v3 = vmul.f32 %v3515_v0, %v3515_v0  ;;  %v40_v7 = vld [vmem:[%s4082_s2 + $0x18] sm:$0xff] }
   0x3   :  { %v3526_v5 = vpack.c.bf16 %v38_v2, %v37_v1  ;;  %v3537_v9 = vpack.c.bf16 %v40_v7, %v39_v6 }
   0x4   :  { %v31_v8 = vsel %vm30_vm0, %v29_v3, 0.0 }
   0x5   :  { %2874 = vmatpush3.bf16.msra.mxu0 %v3526_v5  ;;  %2898 = vmatpush3.bf16.msra.mxu1 %v3526_v5 }
   0x6   :  { %13 = vsyncpa [#allocation6], 0  ;;  %32 = vadd.xlane.f32.xlu0 %v31_v8  ;;  %2875 = vmatprep.subr.bf16.mxu0 %v3472_v4  ;;  %v41_v10 = vld [vmem:[%s4082_s2 + $0x20] sm:$0xff]  ;;  %v42_v11 = vld [vmem:[%s4082_s2 + $0x28] sm:$0xff]  ;;  %vm3473_vm1 = vmmov 0   ;;  %v3474_v28 = vmov 0.0  }
   0x7   :  { %2899 = vmatprep.subr.bf16.mxu1 %v3472_v4  ;;  %v3549_v12 = vpack.c.bf16 %v42_v11, %v41_v10  ;;  %v43_v13 = vld [vmem:[%s4082_s2 + $0x30] sm:$0xff]  ;;  %v44_v14 = vld [vmem:[%s4082_s2 + $0x38] sm:$0xff]  ;;  %v45_v16 = vld [vmem:[%s4082_s2 + $0x40] sm:$0xff]  ;;  %2169 = vmatprep.mubr.msk.f32.mxu0 %vm3473_vm1, %v3474_v28  ;;  %s3475_s12 = smov [#allocation3]  }
   0x8   :  { %v3561_v15 = vpack.c.bf16 %v44_v14, %v43_v13  ;;  %v46_v17 = vld [vmem:[%s4082_s2 + $0x48] sm:$0xff]  ;;  %v47_v19 = vld [vmem:[%s4082_s2 + $0x50] sm:$0xff]  ;;  %v48_v20 = vld [vmem:[%s4082_s2 + $0x58] sm:$0xff]  ;;  %2204 = vmatprep.mubr.msk.f32.mxu1 %vm3473_vm1, %v3474_v28  ;;  %s1757_s13 = sshll.u32 %s3475_s12, 4  ;;  %s1758_s13 = int_to_ptr.vmem [resolvable:$true] %s1757_s13 }
   0x9   :  { %2877 = vmatpush3.bf16.msra.mxu0 %v3537_v9  ;;  %2901 = vmatpush3.bf16.msra.mxu1 %v3537_v9  ;;  %v3575_v18 = vpack.c.bf16 %v46_v17, %v45_v16  ;;  %v3587_v21 = vpack.c.bf16 %v48_v20, %v47_v19  ;;  %v49_v22 = vld [vmem:[%s4082_s2 + $0x60] sm:$0xff]  ;;  %v50_v23 = vld [vmem:[%s4082_s2 + $0x68] sm:$0xff]  ;;  %v51_v25 = vld [vmem:[%s4082_s2 + $0x70] sm:$0xff]  ;;  %s3424_s14 = scalar_lea.vmem %s1758_s13, 32  ;;  %p3429_p1 = scmp.lt.s32.totalorder %s1758_s13, %s1758_s13 }
   0xa   :  { %2878 = vmatprep.subr.bf16.mxu0 %v3472_v4  ;;  %2902 = vmatprep.subr.bf16.mxu1 %v3472_v4  ;;  %v3599_v24 = vpack.c.bf16 %v50_v23, %v49_v22  ;;  %v52_v26 = vld [vmem:[%s4082_s2 + $0x78] sm:$0xff]  ;;  %v3644_v33 = vld [vmem:[%s4081_s1] sm:$0x3]  ;;  %p3425_p0 = scmp.ne.s32.totalorder %s1758_s13, %s3424_s14  ;;  %p3430_p2 = scmp.lt.s32.totalorder %s3424_s14, %s3424_s14 }
   0xb   :  { %v3611_v27 = vpack.c.bf16 %v52_v26, %v51_v25 }
   0xc   :  { %p3431_p3 = por %p3430_p2, %p3429_p1 }
   0xd   :  { %2880 = vmatpush3.bf16.msra.mxu0 %v3549_v12  ;;  %2904 = vmatpush3.bf16.msra.mxu1 %v3549_v12 }
   0xe   :  { %2881 = vmatprep.subr.bf16.mxu0 %v3472_v4  ;;  %2905 = vmatprep.subr.bf16.mxu1 %v3472_v4  ;;  %p3432_p4 = pnand %p3431_p3, %p3425_p0 }
  0x11   :  { %2883 = vmatpush3.bf16.msra.mxu0 %v3561_v15  ;;  %2907 = vmatpush3.bf16.msra.mxu1 %v3561_v15 }
  0x12   :  { %2884 = vmatprep.subr.bf16.mxu0 %v3472_v4  ;;  %2908 = vmatprep.subr.bf16.mxu1 %v3472_v4 }
  0x15   :  { %2886 = vmatpush3.bf16.msra.mxu0 %v3575_v18  ;;  %2910 = vmatpush3.bf16.msra.mxu1 %v3575_v18 }
  0x16   :  { %2887 = vmatprep.subr.bf16.mxu0 %v3472_v4  ;;  %2911 = vmatprep.subr.bf16.mxu1 %v3472_v4 }
  0x19   :  { %2889 = vmatpush3.bf16.msra.mxu0 %v3587_v21  ;;  %2913 = vmatpush3.bf16.msra.mxu1 %v3587_v21 }
  0x1a   :  { %2890 = vmatprep.subr.bf16.mxu0 %v3472_v4  ;;  %2914 = vmatprep.subr.bf16.mxu1 %v3472_v4 }
  0x1d   :  { %2892 = vmatpush3.bf16.msra.mxu0 %v3599_v24  ;;  %2916 = vmatpush3.bf16.msra.mxu1 %v3599_v24 }
  0x1e   :  { %2893 = vmatprep.subr.bf16.mxu0 %v3472_v4  ;;  %2917 = vmatprep.subr.bf16.mxu1 %v3472_v4 }
  0x21   :  { %2895 = vmatpush3.bf16.msra.mxu0 %v3611_v27  ;;  %2919 = vmatpush3.bf16.msra.mxu1 %v3611_v27 }
  0x22   :  { %2920 = vmatprep.subr.bf16.mxu0 %v3472_v4  ;;  %2944 = vmatprep.subr.bf16.mxu1 %v3472_v4 }
  0x93   :  { %v33_v29 = vpop.xlane.xlu0 %32 }
  0x94   :  { %3381 = vrsqrt.f32 %v33_v29 }
  0x9e   :  { %v3382_v30 = vpop.eup %3381 }
  0x9f   :  { %v35_v31 = vmin.f32 %v3382_v30, 1.0 }
  0xa1   :  { %v36_v32 = vmul.f32 %v35_v31, %v3515_v0 }
  0xa3   :  { %2170 = vmatmul.mubr.f32.vlgmr.msra.gmra.mrb[0].mxu0 %v36_v32 }
  0xa4   :  { %2922 = vmatpush3.bf16.msra.mxu0 %v3526_v5  ;;  %2239 = vmatprep.mubr.msk.f32.mxu0 %vm3473_vm1, %v3474_v28 }
  0xa5   :  { %2923 = vmatprep.subr.bf16.mxu0 %v3472_v4 }
  0xa8   :  { %2925 = vmatpush3.bf16.msra.mxu0 %v3537_v9 }
  0xa9   :  { %2926 = vmatprep.subr.bf16.mxu0 %v3472_v4 }
  0xac   :  { %2928 = vmatpush3.bf16.msra.mxu0 %v3549_v12 }
  0xad   :  { %2929 = vmatprep.subr.bf16.mxu0 %v3472_v4 }
  0xb0   :  { %2931 = vmatpush3.bf16.msra.mxu0 %v3561_v15 }
  0xb1   :  { %2932 = vmatprep.subr.bf16.mxu0 %v3472_v4 }
  0xb4   :  { %2934 = vmatpush3.bf16.msra.mxu0 %v3575_v18 }
  0xb5   :  { %2935 = vmatprep.subr.bf16.mxu0 %v3472_v4 }
  0xb8   :  { %2937 = vmatpush3.bf16.msra.mxu0 %v3587_v21 }
  0xb9   :  { %2938 = vmatprep.subr.bf16.mxu0 %v3472_v4 }
  0xbc   :  { %2940 = vmatpush3.bf16.msra.mxu0 %v3599_v24 }
  0xbd   :  { %2941 = vmatprep.subr.bf16.mxu0 %v3472_v4 }
  0xc0   :  { %2943 = vmatpush3.bf16.msra.mxu0 %v3611_v27 }
  0xc1   :  { %2968 = vmatprep.subr.bf16.mxu0 %v3472_v4 }
 0x176   :  { %v120_v34 = vpop.f32.mrb[0].mxu0 }
 0x177   :  { %v121_v35 = vadd.f32 %v120_v34, %v3644_v33  ;;  %v2171_v36 = vpop.f32.mrb[1].mxu0 }
 0x179   :  { %v124_v37 = vmul.f32 0.0009765625, %v121_v35 }
 0x17b   :  { %v125_v38 = vmul.f32 0.001, %v124_v37 }
 0x17d   :  { %v126_v39 = vsub.f32 %v36_v32, %v125_v38 }
 0x17f   :  { %v127_v40 = vmul.f32 %v126_v39, %v126_v39 }
 0x181   :  { %v128_v41 = vsel %vm30_vm0, %v127_v40, 0.0 }
 0x182   :  { %129 = vadd.xlane.f32.xlu0 %v128_v41 }
 0x20f   :  { %v130_v42 = vpop.xlane.xlu0 %129 }
 0x210   :  { %3383 = vrsqrt.f32 %v130_v42 }
 0x21a   :  { %v3384_v43 = vpop.eup %3383 }
 0x21b   :  { %v132_v44 = vmin.f32 %v3384_v43, 1.0 }
 0x21d   :  { %v133_v45 = vmul.f32 %v132_v44, %v126_v39 }
 0x21f   :  { %2205 = vmatmul.mubr.f32.vlgmr.msra.gmra.mrb[0].mxu1 %v133_v45 }
 0x220   :  { %2946 = vmatpush3.bf16.msra.mxu1 %v3526_v5  ;;  %2274 = vmatprep.mubr.msk.f32.mxu1 %vm3473_vm1, %v3474_v28 }
 0x221   :  { %2947 = vmatprep.subr.bf16.mxu1 %v3472_v4 }
 0x224   :  { %2949 = vmatpush3.bf16.msra.mxu1 %v3537_v9 }
 0x225   :  { %2950 = vmatprep.subr.bf16.mxu1 %v3472_v4 }
 0x228   :  { %2952 = vmatpush3.bf16.msra.mxu1 %v3549_v12 }
 0x229   :  { %2953 = vmatprep.subr.bf16.mxu1 %v3472_v4 }
 0x22c   :  { %2955 = vmatpush3.bf16.msra.mxu1 %v3561_v15 }
 0x22d   :  { %2956 = vmatprep.subr.bf16.mxu1 %v3472_v4 }
 0x230   :  { %2958 = vmatpush3.bf16.msra.mxu1 %v3575_v18 }
 0x231   :  { %2959 = vmatprep.subr.bf16.mxu1 %v3472_v4 }
 0x234   :  { %2961 = vmatpush3.bf16.msra.mxu1 %v3587_v21 }
 0x235   :  { %2962 = vmatprep.subr.bf16.mxu1 %v3472_v4 }
 0x238   :  { %2964 = vmatpush3.bf16.msra.mxu1 %v3599_v24 }
 0x239   :  { %2965 = vmatprep.subr.bf16.mxu1 %v3472_v4 }
 0x23c   :  { %2967 = vmatpush3.bf16.msra.mxu1 %v3611_v27 }
 0x23d   :  { %2992 = vmatprep.subr.bf16.mxu1 %v3472_v4 }
 0x2f2   :  { %v200_v46 = vpop.f32.mrb[0].mxu1 }
 0x2f3   :  { %v201_v47 = vadd.f32 %v200_v46, %v3644_v33  ;;  %v2206_v48 = vpop.f32.mrb[1].mxu1 }
 0x2f5   :  { %v204_v49 = vmul.f32 0.0009765625, %v201_v47 }
 0x2f7   :  { %v205_v50 = vmul.f32 0.001, %v204_v49 }
 0x2f9   :  { %v206_v51 = vsub.f32 %v133_v45, %v205_v50 }
 0x2fb   :  { %v207_v52 = vmul.f32 %v206_v51, %v206_v51 }
 0x2fd   :  { %v208_v53 = vsel %vm30_vm0, %v207_v52, 0.0 }
 0x2fe   :  { %209 = vadd.xlane.f32.xlu1 %v208_v53 }
 0x38b   :  { %v210_v54 = vpop.xlane.xlu1 %209 }
 0x38c   :  { %3385 = vrsqrt.f32 %v210_v54 }
 0x396   :  { %v3386_v55 = vpop.eup %3385 }
 0x397   :  { %v212_v56 = vmin.f32 %v3386_v55, 1.0 }
 0x399   :  { %v213_v57 = vmul.f32 %v212_v56, %v206_v51 }
 0x39b   :  { %2240 = vmatmul.mubr.f32.vlgmr.msra.gmra.mrb[2].mxu0 %v213_v57 }
 0x39c   :  { %2970 = vmatpush3.bf16.msra.mxu0 %v3526_v5  ;;  %2309 = vmatprep.mubr.msk.f32.mxu0 %vm3473_vm1, %v3474_v28 }
 0x39d   :  { %2971 = vmatprep.subr.bf16.mxu0 %v3472_v4 }
 0x3a0   :  { %2973 = vmatpush3.bf16.msra.mxu0 %v3537_v9 }
 0x3a1   :  { %2974 = vmatprep.subr.bf16.mxu0 %v3472_v4 }
 0x3a4   :  { %2976 = vmatpush3.bf16.msra.mxu0 %v3549_v12 }
 0x3a5   :  { %2977 = vmatprep.subr.bf16.mxu0 %v3472_v4 }
 0x3a8   :  { %2979 = vmatpush3.bf16.msra.mxu0 %v3561_v15 }
 0x3a9   :  { %2980 = vmatprep.subr.bf16.mxu0 %v3472_v4 }
 0x3ac   :  { %2982 = vmatpush3.bf16.msra.mxu0 %v3575_v18 }
 0x3ad   :  { %2983 = vmatprep.subr.bf16.mxu0 %v3472_v4 }
 0x3b0   :  { %2985 = vmatpush3.bf16.msra.mxu0 %v3587_v21 }
 0x3b1   :  { %2986 = vmatprep.subr.bf16.mxu0 %v3472_v4 }
 0x3b4   :  { %2988 = vmatpush3.bf16.msra.mxu0 %v3599_v24 }
 0x3b5   :  { %2989 = vmatprep.subr.bf16.mxu0 %v3472_v4 }
 0x3b8   :  { %2991 = vmatpush3.bf16.msra.mxu0 %v3611_v27 }
 0x3b9   :  { %3016 = vmatprep.subr.bf16.mxu0 %v3472_v4 }
 0x46e   :  { %v280_v58 = vpop.f32.mrb[2].mxu0 }
 0x46f   :  { %v281_v59 = vadd.f32 %v280_v58, %v3644_v33  ;;  %v2241_v60 = vpop.f32.mrb[3].mxu0 }
 0x471   :  { %v284_v61 = vmul.f32 0.0009765625, %v281_v59 }
 0x473   :  { %v285_v62 = vmul.f32 0.001, %v284_v61 }
 0x475   :  { %v286_v63 = vsub.f32 %v213_v57, %v285_v62 }
 0x477   :  { %v287_v0 = vmul.f32 %v286_v63, %v286_v63 }
 0x479   :  { %v288_v1 = vsel %vm30_vm0, %v287_v0, 0.0 }
 0x47a   :  { %289 = vadd.xlane.f32.xlu1 %v288_v1 }
 0x507   :  { %v290_v2 = vpop.xlane.xlu1 %289 }
 0x508   :  { %3387 = vrsqrt.f32 %v290_v2 }
 0x512   :  { %v3388_v3 = vpop.eup %3387 }
 0x513   :  { %v292_v6 = vmin.f32 %v3388_v3, 1.0 }
 0x515   :  { %v293_v7 = vmul.f32 %v292_v6, %v286_v63 }
 0x517   :  { %2275 = vmatmul.mubr.f32.vlgmr.msra.gmra.mrb[2].mxu1 %v293_v7 }
 0x518   :  { %2994 = vmatpush3.bf16.msra.mxu1 %v3526_v5  ;;  %2344 = vmatprep.mubr.msk.f32.mxu1 %vm3473_vm1, %v3474_v28 }
 0x519   :  { %2995 = vmatprep.subr.bf16.mxu1 %v3472_v4 }
 0x51c   :  { %2997 = vmatpush3.bf16.msra.mxu1 %v3537_v9 }
 0x51d   :  { %2998 = vmatprep.subr.bf16.mxu1 %v3472_v4 }
 0x520   :  { %3000 = vmatpush3.bf16.msra.mxu1 %v3549_v12 }
 0x521   :  { %3001 = vmatprep.subr.bf16.mxu1 %v3472_v4 }
 0x524   :  { %3003 = vmatpush3.bf16.msra.mxu1 %v3561_v15 }
 0x525   :  { %3004 = vmatprep.subr.bf16.mxu1 %v3472_v4 }
 0x528   :  { %3006 = vmatpush3.bf16.msra.mxu1 %v3575_v18 }
 0x529   :  { %3007 = vmatprep.subr.bf16.mxu1 %v3472_v4 }
 0x52c   :  { %3009 = vmatpush3.bf16.msra.mxu1 %v3587_v21 }
 0x52d   :  { %3010 = vmatprep.subr.bf16.mxu1 %v3472_v4 }
 0x530   :  { %3012 = vmatpush3.bf16.msra.mxu1 %v3599_v24 }
 0x531   :  { %3013 = vmatprep.subr.bf16.mxu1 %v3472_v4 }
 0x534   :  { %3015 = vmatpush3.bf16.msra.mxu1 %v3611_v27 }
 0x535   :  { %3040 = vmatprep.subr.bf16.mxu1 %v3472_v4 }
 0x5ea   :  { %v360_v8 = vpop.f32.mrb[2].mxu1 }
 0x5eb   :  { %v361_v10 = vadd.f32 %v360_v8, %v3644_v33  ;;  %v2276_v11 = vpop.f32.mrb[3].mxu1 }
 0x5ed   :  { %v364_v13 = vmul.f32 0.0009765625, %v361_v10 }
 0x5ef   :  { %v365_v14 = vmul.f32 0.001, %v364_v13 }
 0x5f1   :  { %v366_v16 = vsub.f32 %v293_v7, %v365_v14 }
 0x5f3   :  { %v367_v17 = vmul.f32 %v366_v16, %v366_v16 }
 0x5f5   :  { %v368_v19 = vsel %vm30_vm0, %v367_v17, 0.0 }
 0x5f6   :  { %369 = vadd.xlane.f32.xlu0 %v368_v19 }
 0x683   :  { %v370_v20 = vpop.xlane.xlu0 %369 }
 0x684   :  { %3389 = vrsqrt.f32 %v370_v20 }
 0x68e   :  { %v3390_v22 = vpop.eup %3389 }
 0x68f   :  { %v372_v23 = vmin.f32 %v3390_v22, 1.0 }
 0x691   :  { %v373_v25 = vmul.f32 %v372_v23, %v366_v16 }
 0x693   :  { %2310 = vmatmul.mubr.f32.vlgmr.msra.gmra.mrb[4].mxu0 %v373_v25 }
 0x694   :  { %3018 = vmatpush3.bf16.msra.mxu0 %v3526_v5  ;;  %2379 = vmatprep.mubr.msk.f32.mxu0 %vm3473_vm1, %v3474_v28 }
 0x695   :  { %3019 = vmatprep.subr.bf16.mxu0 %v3472_v4 }
 0x698   :  { %3021 = vmatpush3.bf16.msra.mxu0 %v3537_v9 }
 0x699   :  { %3022 = vmatprep.subr.bf16.mxu0 %v3472_v4 }
 0x69c   :  { %3024 = vmatpush3.bf16.msra.mxu0 %v3549_v12 }
 0x69d   :  { %3025 = vmatprep.subr.bf16.mxu0 %v3472_v4 }
 0x6a0   :  { %3027 = vmatpush3.bf16.msra.mxu0 %v3561_v15 }
 0x6a1   :  { %3028 = vmatprep.subr.bf16.mxu0 %v3472_v4 }
 0x6a4   :  { %3030 = vmatpush3.bf16.msra.mxu0 %v3575_v18 }
 0x6a5   :  { %3031 = vmatprep.subr.bf16.mxu0 %v3472_v4 }
 0x6a8   :  { %3033 = vmatpush3.bf16.msra.mxu0 %v3587_v21 }
 0x6a9   :  { %3034 = vmatprep.subr.bf16.mxu0 %v3472_v4 }
 0x6ac   :  { %3036 = vmatpush3.bf16.msra.mxu0 %v3599_v24 }
 0x6ad   :  { %3037 = vmatprep.subr.bf16.mxu0 %v3472_v4 }
 0x6b0   :  { %3039 = vmatpush3.bf16.msra.mxu0 %v3611_v27 }
 0x6b1   :  { %3064 = vmatprep.subr.bf16.mxu0 %v3472_v4 }
 0x766   :  { %v440_v26 = vpop.f32.mrb[4].mxu0 }
 0x767   :  { %v441_v29 = vadd.f32 %v440_v26, %v3644_v33  ;;  %v2311_v30 = vpop.f32.mrb[5].mxu0 }
 0x769   :  { %v444_v31 = vmul.f32 0.0009765625, %v441_v29 }
 0x76b   :  { %v445_v32 = vmul.f32 0.001, %v444_v31 }
 0x76d   :  { %v446_v34 = vsub.f32 %v373_v25, %v445_v32 }
 0x76f   :  { %v447_v35 = vmul.f32 %v446_v34, %v446_v34 }
 0x771   :  { %v448_v36 = vsel %vm30_vm0, %v447_v35, 0.0 }
 0x772   :  { %449 = vadd.xlane.f32.xlu1 %v448_v36 }
 0x7ff   :  { %v450_v37 = vpop.xlane.xlu1 %449 }
 0x800   :  { %3391 = vrsqrt.f32 %v450_v37 }
 0x80a   :  { %v3392_v38 = vpop.eup %3391 }
 0x80b   :  { %v452_v39 = vmin.f32 %v3392_v38, 1.0 }
 0x80d   :  { %v453_v40 = vmul.f32 %v452_v39, %v446_v34 }
 0x80f   :  { %2345 = vmatmul.mubr.f32.vlgmr.msra.gmra.mrb[4].mxu1 %v453_v40 }
 0x810   :  { %3042 = vmatpush3.bf16.msra.mxu1 %v3526_v5  ;;  %2414 = vmatprep.mubr.msk.f32.mxu1 %vm3473_vm1, %v3474_v28 }
 0x811   :  { %3043 = vmatprep.subr.bf16.mxu1 %v3472_v4 }
 0x814   :  { %3045 = vmatpush3.bf16.msra.mxu1 %v3537_v9 }
 0x815   :  { %3046 = vmatprep.subr.bf16.mxu1 %v3472_v4 }
 0x818   :  { %3048 = vmatpush3.bf16.msra.mxu1 %v3549_v12 }
 0x819   :  { %3049 = vmatprep.subr.bf16.mxu1 %v3472_v4 }
 0x81c   :  { %3051 = vmatpush3.bf16.msra.mxu1 %v3561_v15 }
 0x81d   :  { %3052 = vmatprep.subr.bf16.mxu1 %v3472_v4 }
 0x820   :  { %3054 = vmatpush3.bf16.msra.mxu1 %v3575_v18 }
 0x821   :  { %3055 = vmatprep.subr.bf16.mxu1 %v3472_v4 }
 0x824   :  { %3057 = vmatpush3.bf16.msra.mxu1 %v3587_v21 }
 0x825   :  { %3058 = vmatprep.subr.bf16.mxu1 %v3472_v4 }
 0x828   :  { %3060 = vmatpush3.bf16.msra.mxu1 %v3599_v24 }
 0x829   :  { %3061 = vmatprep.subr.bf16.mxu1 %v3472_v4 }
 0x82c   :  { %3063 = vmatpush3.bf16.msra.mxu1 %v3611_v27 }
 0x82d   :  { %3088 = vmatprep.subr.bf16.mxu1 %v3472_v4 }
 0x8e2   :  { %v520_v41 = vpop.f32.mrb[4].mxu1 }
 0x8e3   :  { %v521_v42 = vadd.f32 %v520_v41, %v3644_v33  ;;  %v2346_v43 = vpop.f32.mrb[5].mxu1 }
 0x8e5   :  { %v524_v44 = vmul.f32 0.0009765625, %v521_v42 }
 0x8e7   :  { %v525_v45 = vmul.f32 0.001, %v524_v44 }
 0x8e9   :  { %v526_v46 = vsub.f32 %v453_v40, %v525_v45 }
 0x8eb   :  { %v527_v47 = vmul.f32 %v526_v46, %v526_v46 }
 0x8ed   :  { %v528_v48 = vsel %vm30_vm0, %v527_v47, 0.0 }
 0x8ee   :  { %529 = vadd.xlane.f32.xlu0 %v528_v48 }
 0x97b   :  { %v530_v49 = vpop.xlane.xlu0 %529 }
 0x97c   :  { %3393 = vrsqrt.f32 %v530_v49 }
 0x986   :  { %v3394_v50 = vpop.eup %3393 }
 0x987   :  { %v532_v51 = vmin.f32 %v3394_v50, 1.0 }
 0x989   :  { %v533_v52 = vmul.f32 %v532_v51, %v526_v46 }
 0x98b   :  { %2380 = vmatmul.mubr.f32.vlgmr.msra.gmra.mrb[6].mxu0 %v533_v52 }
 0x98c   :  { %3066 = vmatpush3.bf16.msra.mxu0 %v3526_v5  ;;  %2449 = vmatprep.mubr.msk.f32.mxu0 %vm3473_vm1, %v3474_v28 }
 0x98d   :  { %3067 = vmatprep.subr.bf16.mxu0 %v3472_v4 }
 0x990   :  { %3069 = vmatpush3.bf16.msra.mxu0 %v3537_v9 }
 0x991   :  { %3070 = vmatprep.subr.bf16.mxu0 %v3472_v4 }
 0x994   :  { %3072 = vmatpush3.bf16.msra.mxu0 %v3549_v12 }
 0x995   :  { %3073 = vmatprep.subr.bf16.mxu0 %v3472_v4 }
 0x998   :  { %3075 = vmatpush3.bf16.msra.mxu0 %v3561_v15 }
 0x999   :  { %3076 = vmatprep.subr.bf16.mxu0 %v3472_v4 }
 0x99c   :  { %3078 = vmatpush3.bf16.msra.mxu0 %v3575_v18 }
 0x99d   :  { %3079 = vmatprep.subr.bf16.mxu0 %v3472_v4 }
 0x9a0   :  { %3081 = vmatpush3.bf16.msra.mxu0 %v3587_v21 }
 0x9a1   :  { %3082 = vmatprep.subr.bf16.mxu0 %v3472_v4 }
 0x9a4   :  { %3084 = vmatpush3.bf16.msra.mxu0 %v3599_v24 }
 0x9a5   :  { %3085 = vmatprep.subr.bf16.mxu0 %v3472_v4 }
 0x9a8   :  { %3087 = vmatpush3.bf16.msra.mxu0 %v3611_v27 }
 0x9a9   :  { %3112 = vmatprep.subr.bf16.mxu0 %v3472_v4 }
 0xa5e   :  { %v600_v53 = vpop.f32.mrb[6].mxu0 }
 0xa5f   :  { %v601_v54 = vadd.f32 %v600_v53, %v3644_v33  ;;  %v2381_v55 = vpop.f32.mrb[7].mxu0 }
 0xa61   :  { %v604_v56 = vmul.f32 0.0009765625, %v601_v54 }
 0xa63   :  { %v605_v57 = vmul.f32 0.001, %v604_v56 }
 0xa65   :  { %v606_v58 = vsub.f32 %v533_v52, %v605_v57 }
 0xa67   :  { %v607_v59 = vmul.f32 %v606_v58, %v606_v58 }
 0xa69   :  { %v608_v60 = vsel %vm30_vm0, %v607_v59, 0.0 }
 0xa6a   :  { %609 = vadd.xlane.f32.xlu1 %v608_v60 }
 0xaf7   :  { %v610_v61 = vpop.xlane.xlu1 %609 }
 0xaf8   :  { %3395 = vrsqrt.f32 %v610_v61 }
 0xb02   :  { %v3396_v62 = vpop.eup %3395 }
 0xb03   :  { %v612_v63 = vmin.f32 %v3396_v62, 1.0 }
 0xb05   :  { %v613_v0 = vmul.f32 %v612_v63, %v606_v58 }
 0xb07   :  { %2415 = vmatmul.mubr.f32.vlgmr.msra.gmra.mrb[6].mxu1 %v613_v0 }
 0xb08   :  { %3090 = vmatpush3.bf16.msra.mxu1 %v3526_v5  ;;  %2484 = vmatprep.mubr.msk.f32.mxu1 %vm3473_vm1, %v3474_v28 }
 0xb09   :  { %3091 = vmatprep.subr.bf16.mxu1 %v3472_v4 }
 0xb0c   :  { %3093 = vmatpush3.bf16.msra.mxu1 %v3537_v9 }
 0xb0d   :  { %3094 = vmatprep.subr.bf16.mxu1 %v3472_v4 }
 0xb10   :  { %3096 = vmatpush3.bf16.msra.mxu1 %v3549_v12 }
 0xb11   :  { %3097 = vmatprep.subr.bf16.mxu1 %v3472_v4 }
 0xb14   :  { %3099 = vmatpush3.bf16.msra.mxu1 %v3561_v15 }
 0xb15   :  { %3100 = vmatprep.subr.bf16.mxu1 %v3472_v4 }
 0xb18   :  { %3102 = vmatpush3.bf16.msra.mxu1 %v3575_v18 }
 0xb19   :  { %3103 = vmatprep.subr.bf16.mxu1 %v3472_v4 }
 0xb1c   :  { %3105 = vmatpush3.bf16.msra.mxu1 %v3587_v21 }
 0xb1d   :  { %3106 = vmatprep.subr.bf16.mxu1 %v3472_v4 }
 0xb20   :  { %3108 = vmatpush3.bf16.msra.mxu1 %v3599_v24 }
 0xb21   :  { %3109 = vmatprep.subr.bf16.mxu1 %v3472_v4 }
 0xb24   :  { %3111 = vmatpush3.bf16.msra.mxu1 %v3611_v27 }
 0xb25   :  { %3136 = vmatprep.subr.bf16.mxu1 %v3472_v4 }
 0xbda   :  { %v680_v1 = vpop.f32.mrb[6].mxu1 }
 0xbdb   :  { %v681_v2 = vadd.f32 %v680_v1, %v3644_v33  ;;  %v2416_v3 = vpop.f32.mrb[7].mxu1 }
 0xbdd   :  { %v684_v6 = vmul.f32 0.0009765625, %v681_v2 }
 0xbdf   :  { %v685_v7 = vmul.f32 0.001, %v684_v6 }
 0xbe1   :  { %v686_v8 = vsub.f32 %v613_v0, %v685_v7 }
 0xbe3   :  { %v687_v10 = vmul.f32 %v686_v8, %v686_v8 }
 0xbe5   :  { %v688_v11 = vsel %vm30_vm0, %v687_v10, 0.0 }
 0xbe6   :  { %689 = vadd.xlane.f32.xlu0 %v688_v11 }
 0xc73   :  { %v690_v13 = vpop.xlane.xlu0 %689 }
 0xc74   :  { %3397 = vrsqrt.f32 %v690_v13 }
 0xc7e   :  { %v3398_v14 = vpop.eup %3397 }
 0xc7f   :  { %v692_v16 = vmin.f32 %v3398_v14, 1.0 }
 0xc81   :  { %v693_v17 = vmul.f32 %v692_v16, %v686_v8 }
 0xc83   :  { %2450 = vmatmul.mubr.f32.vlgmr.msra.gmra.mrb[8].mxu0 %v693_v17 }
 0xc84   :  { %3114 = vmatpush3.bf16.msra.mxu0 %v3526_v5  ;;  %2519 = vmatprep.mubr.msk.f32.mxu0 %vm3473_vm1, %v3474_v28 }
 0xc85   :  { %3115 = vmatprep.subr.bf16.mxu0 %v3472_v4 }
 0xc88   :  { %3117 = vmatpush3.bf16.msra.mxu0 %v3537_v9 }
 0xc89   :  { %3118 = vmatprep.subr.bf16.mxu0 %v3472_v4 }
 0xc8c   :  { %3120 = vmatpush3.bf16.msra.mxu0 %v3549_v12 }
 0xc8d   :  { %3121 = vmatprep.subr.bf16.mxu0 %v3472_v4 }
 0xc90   :  { %3123 = vmatpush3.bf16.msra.mxu0 %v3561_v15 }
 0xc91   :  { %3124 = vmatprep.subr.bf16.mxu0 %v3472_v4 }
 0xc94   :  { %3126 = vmatpush3.bf16.msra.mxu0 %v3575_v18 }
 0xc95   :  { %3127 = vmatprep.subr.bf16.mxu0 %v3472_v4 }
 0xc98   :  { %3129 = vmatpush3.bf16.msra.mxu0 %v3587_v21 }
 0xc99   :  { %3130 = vmatprep.subr.bf16.mxu0 %v3472_v4 }
 0xc9c   :  { %3132 = vmatpush3.bf16.msra.mxu0 %v3599_v24 }
 0xc9d   :  { %3133 = vmatprep.subr.bf16.mxu0 %v3472_v4 }
 0xca0   :  { %3135 = vmatpush3.bf16.msra.mxu0 %v3611_v27 }
 0xca1   :  { %3160 = vmatprep.subr.bf16.mxu0 %v3472_v4 }
 0xd56   :  { %v760_v19 = vpop.f32.mrb[8].mxu0 }
 0xd57   :  { %v761_v20 = vadd.f32 %v760_v19, %v3644_v33  ;;  %v2451_v22 = vpop.f32.mrb[9].mxu0 }
 0xd59   :  { %v764_v23 = vmul.f32 0.0009765625, %v761_v20 }
 0xd5b   :  { %v765_v25 = vmul.f32 0.001, %v764_v23 }
 0xd5d   :  { %v766_v26 = vsub.f32 %v693_v17, %v765_v25 }
 0xd5f   :  { %v767_v29 = vmul.f32 %v766_v26, %v766_v26 }
 0xd61   :  { %v768_v30 = vsel %vm30_vm0, %v767_v29, 0.0 }
 0xd62   :  { %769 = vadd.xlane.f32.xlu1 %v768_v30 }
 0xdef   :  { %v770_v31 = vpop.xlane.xlu1 %769 }
 0xdf0   :  { %3399 = vrsqrt.f32 %v770_v31 }
 0xdfa   :  { %v3400_v32 = vpop.eup %3399 }
 0xdfb   :  { %v772_v34 = vmin.f32 %v3400_v32, 1.0 }
 0xdfd   :  { %v773_v35 = vmul.f32 %v772_v34, %v766_v26 }
 0xdff   :  { %2485 = vmatmul.mubr.f32.vlgmr.msra.gmra.mrb[8].mxu1 %v773_v35 }
 0xe00   :  { %3138 = vmatpush3.bf16.msra.mxu1 %v3526_v5  ;;  %2554 = vmatprep.mubr.msk.f32.mxu1 %vm3473_vm1, %v3474_v28 }
 0xe01   :  { %3139 = vmatprep.subr.bf16.mxu1 %v3472_v4 }
 0xe04   :  { %3141 = vmatpush3.bf16.msra.mxu1 %v3537_v9 }
 0xe05   :  { %3142 = vmatprep.subr.bf16.mxu1 %v3472_v4 }
 0xe08   :  { %3144 = vmatpush3.bf16.msra.mxu1 %v3549_v12 }
 0xe09   :  { %3145 = vmatprep.subr.bf16.mxu1 %v3472_v4 }
 0xe0c   :  { %3147 = vmatpush3.bf16.msra.mxu1 %v3561_v15 }
 0xe0d   :  { %3148 = vmatprep.subr.bf16.mxu1 %v3472_v4 }
 0xe10   :  { %3150 = vmatpush3.bf16.msra.mxu1 %v3575_v18 }
 0xe11   :  { %3151 = vmatprep.subr.bf16.mxu1 %v3472_v4 }
 0xe14   :  { %3153 = vmatpush3.bf16.msra.mxu1 %v3587_v21 }
 0xe15   :  { %3154 = vmatprep.subr.bf16.mxu1 %v3472_v4 }
 0xe18   :  { %3156 = vmatpush3.bf16.msra.mxu1 %v3599_v24 }
 0xe19   :  { %3157 = vmatprep.subr.bf16.mxu1 %v3472_v4 }
 0xe1c   :  { %3159 = vmatpush3.bf16.msra.mxu1 %v3611_v27 }
 0xe1d   :  { %3184 = vmatprep.subr.bf16.mxu1 %v3472_v4 }
 0xed2   :  { %v840_v36 = vpop.f32.mrb[8].mxu1 }
 0xed3   :  { %v841_v37 = vadd.f32 %v840_v36, %v3644_v33  ;;  %v2486_v38 = vpop.f32.mrb[9].mxu1 }
 0xed5   :  { %v844_v39 = vmul.f32 0.0009765625, %v841_v37 }
 0xed7   :  { %v845_v40 = vmul.f32 0.001, %v844_v39 }
 0xed9   :  { %v846_v41 = vsub.f32 %v773_v35, %v845_v40 }
 0xedb   :  { %v847_v42 = vmul.f32 %v846_v41, %v846_v41 }
 0xedd   :  { %v848_v43 = vsel %vm30_vm0, %v847_v42, 0.0 }
 0xede   :  { %849 = vadd.xlane.f32.xlu0 %v848_v43 }
 0xf6b   :  { %v850_v44 = vpop.xlane.xlu0 %849 }
 0xf6c   :  { %3401 = vrsqrt.f32 %v850_v44 }
 0xf76   :  { %v3402_v45 = vpop.eup %3401 }
 0xf77   :  { %v852_v46 = vmin.f32 %v3402_v45, 1.0 }
 0xf79   :  { %v853_v47 = vmul.f32 %v852_v46, %v846_v41 }
 0xf7b   :  { %2520 = vmatmul.mubr.f32.vlgmr.msra.gmra.mrb[10].mxu0 %v853_v47 }
 0xf7c   :  { %3162 = vmatpush3.bf16.msra.mxu0 %v3526_v5  ;;  %2589 = vmatprep.mubr.msk.f32.mxu0 %vm3473_vm1, %v3474_v28 }
 0xf7d   :  { %3163 = vmatprep.subr.bf16.mxu0 %v3472_v4 }
 0xf80   :  { %3165 = vmatpush3.bf16.msra.mxu0 %v3537_v9 }
 0xf81   :  { %3166 = vmatprep.subr.bf16.mxu0 %v3472_v4 }
 0xf84   :  { %3168 = vmatpush3.bf16.msra.mxu0 %v3549_v12 }
 0xf85   :  { %3169 = vmatprep.subr.bf16.mxu0 %v3472_v4 }
 0xf88   :  { %3171 = vmatpush3.bf16.msra.mxu0 %v3561_v15 }
 0xf89   :  { %3172 = vmatprep.subr.bf16.mxu0 %v3472_v4 }
 0xf8c   :  { %3174 = vmatpush3.bf16.msra.mxu0 %v3575_v18 }
 0xf8d   :  { %3175 = vmatprep.subr.bf16.mxu0 %v3472_v4 }
 0xf90   :  { %3177 = vmatpush3.bf16.msra.mxu0 %v3587_v21 }
 0xf91   :  { %3178 = vmatprep.subr.bf16.mxu0 %v3472_v4 }
 0xf94   :  { %3180 = vmatpush3.bf16.msra.mxu0 %v3599_v24 }
 0xf95   :  { %3181 = vmatprep.subr.bf16.mxu0 %v3472_v4 }
 0xf98   :  { %3183 = vmatpush3.bf16.msra.mxu0 %v3611_v27 }
 0xf99   :  { %3208 = vmatprep.subr.bf16.mxu0 %v3472_v4 }
0x104e   :  { %v920_v48 = vpop.f32.mrb[10].mxu0 }
0x104f   :  { %v921_v49 = vadd.f32 %v920_v48, %v3644_v33  ;;  %v2521_v50 = vpop.f32.mrb[11].mxu0 }
0x1051   :  { %v924_v51 = vmul.f32 0.0009765625, %v921_v49 }
0x1053   :  { %v925_v52 = vmul.f32 0.001, %v924_v51 }
0x1055   :  { %v926_v53 = vsub.f32 %v853_v47, %v925_v52 }
0x1057   :  { %v927_v54 = vmul.f32 %v926_v53, %v926_v53 }
0x1059   :  { %v928_v55 = vsel %vm30_vm0, %v927_v54, 0.0 }
0x105a   :  { %929 = vadd.xlane.f32.xlu1 %v928_v55 }
0x10e7   :  { %v930_v56 = vpop.xlane.xlu1 %929 }
0x10e8   :  { %3403 = vrsqrt.f32 %v930_v56 }
0x10f2   :  { %v3404_v57 = vpop.eup %3403 }
0x10f3   :  { %v932_v58 = vmin.f32 %v3404_v57, 1.0 }
0x10f5   :  { %v933_v59 = vmul.f32 %v932_v58, %v926_v53 }
0x10f7   :  { %2555 = vmatmul.mubr.f32.vlgmr.msra.gmra.mrb[10].mxu1 %v933_v59 }
0x10f8   :  { %3186 = vmatpush3.bf16.msra.mxu1 %v3526_v5  ;;  %2624 = vmatprep.mubr.msk.f32.mxu1 %vm3473_vm1, %v3474_v28 }
0x10f9   :  { %3187 = vmatprep.subr.bf16.mxu1 %v3472_v4 }
0x10fc   :  { %3189 = vmatpush3.bf16.msra.mxu1 %v3537_v9 }
0x10fd   :  { %3190 = vmatprep.subr.bf16.mxu1 %v3472_v4 }
0x1100   :  { %3192 = vmatpush3.bf16.msra.mxu1 %v3549_v12 }
0x1101   :  { %3193 = vmatprep.subr.bf16.mxu1 %v3472_v4 }
0x1104   :  { %3195 = vmatpush3.bf16.msra.mxu1 %v3561_v15 }
0x1105   :  { %3196 = vmatprep.subr.bf16.mxu1 %v3472_v4 }
0x1108   :  { %3198 = vmatpush3.bf16.msra.mxu1 %v3575_v18 }
0x1109   :  { %3199 = vmatprep.subr.bf16.mxu1 %v3472_v4 }
0x110c   :  { %3201 = vmatpush3.bf16.msra.mxu1 %v3587_v21 }
0x110d   :  { %3202 = vmatprep.subr.bf16.mxu1 %v3472_v4 }
0x1110   :  { %3204 = vmatpush3.bf16.msra.mxu1 %v3599_v24 }
0x1111   :  { %3205 = vmatprep.subr.bf16.mxu1 %v3472_v4 }
0x1114   :  { %3207 = vmatpush3.bf16.msra.mxu1 %v3611_v27 }
0x1115   :  { %3232 = vmatprep.subr.bf16.mxu1 %v3472_v4 }
0x11ca   :  { %v1000_v60 = vpop.f32.mrb[10].mxu1 }
0x11cb   :  { %v1001_v61 = vadd.f32 %v1000_v60, %v3644_v33  ;;  %v2556_v62 = vpop.f32.mrb[11].mxu1 }
0x11cd   :  { %v1004_v63 = vmul.f32 0.0009765625, %v1001_v61 }
0x11cf   :  { %v1005_v0 = vmul.f32 0.001, %v1004_v63 }
0x11d1   :  { %v1006_v1 = vsub.f32 %v933_v59, %v1005_v0 }
0x11d3   :  { %v1007_v2 = vmul.f32 %v1006_v1, %v1006_v1 }
0x11d5   :  { %v1008_v3 = vsel %vm30_vm0, %v1007_v2, 0.0 }
0x11d6   :  { %1009 = vadd.xlane.f32.xlu0 %v1008_v3  ;;  %v3969_v3 = vld [vmem:[%s4081_s1] sm:$0x3] }
0x1263   :  { %v1010_v6 = vpop.xlane.xlu0 %1009 }
0x1264   :  { %3405 = vrsqrt.f32 %v1010_v6 }
0x126e   :  { %v3406_v7 = vpop.eup %3405 }
0x126f   :  { %v1012_v8 = vmin.f32 %v3406_v7, 1.0 }
0x1271   :  { %v1013_v10 = vmul.f32 %v1012_v8, %v1006_v1 }
0x1273   :  { %2590 = vmatmul.mubr.f32.vlgmr.msra.gmra.mrb[12].mxu0 %v1013_v10 }
0x1274   :  { %3210 = vmatpush3.bf16.msra.mxu0 %v3526_v5  ;;  %2659 = vmatprep.mubr.msk.f32.mxu0 %vm3473_vm1, %v3474_v28 }
0x1275   :  { %3211 = vmatprep.subr.bf16.mxu0 %v3472_v4 }
0x1278   :  { %3213 = vmatpush3.bf16.msra.mxu0 %v3537_v9 }
0x1279   :  { %3214 = vmatprep.subr.bf16.mxu0 %v3472_v4 }
0x127c   :  { %3216 = vmatpush3.bf16.msra.mxu0 %v3549_v12 }
0x127d   :  { %3217 = vmatprep.subr.bf16.mxu0 %v3472_v4 }
0x1280   :  { %3219 = vmatpush3.bf16.msra.mxu0 %v3561_v15 }
0x1281   :  { %3220 = vmatprep.subr.bf16.mxu0 %v3472_v4 }
0x1284   :  { %3222 = vmatpush3.bf16.msra.mxu0 %v3575_v18 }
0x1285   :  { %3223 = vmatprep.subr.bf16.mxu0 %v3472_v4 }
0x1288   :  { %3225 = vmatpush3.bf16.msra.mxu0 %v3587_v21 }
0x1289   :  { %3226 = vmatprep.subr.bf16.mxu0 %v3472_v4 }
0x128c   :  { %3228 = vmatpush3.bf16.msra.mxu0 %v3599_v24 }
0x128d   :  { %3229 = vmatprep.subr.bf16.mxu0 %v3472_v4 }
0x1290   :  { %3231 = vmatpush3.bf16.msra.mxu0 %v3611_v27 }
0x1291   :  { %3256 = vmatprep.subr.bf16.mxu0 %v3472_v4 }
0x1346   :  { %v1080_v11 = vpop.f32.mrb[12].mxu0 }
0x1347   :  { %v1081_v13 = vadd.f32 %v1080_v11, %v3644_v33  ;;  %v2591_v14 = vpop.f32.mrb[13].mxu0 }
0x1349   :  { %v1084_v16 = vmul.f32 0.0009765625, %v1081_v13 }
0x134b   :  { %v1085_v17 = vmul.f32 0.001, %v1084_v16 }
0x134d   :  { %v1086_v19 = vsub.f32 %v1013_v10, %v1085_v17 }
0x134f   :  { %v1087_v20 = vmul.f32 %v1086_v19, %v1086_v19 }
0x1351   :  { %v1088_v22 = vsel %vm30_vm0, %v1087_v20, 0.0 }
0x1352   :  { %1089 = vadd.xlane.f32.xlu1 %v1088_v22 }
0x13df   :  { %v1090_v23 = vpop.xlane.xlu1 %1089 }
0x13e0   :  { %3407 = vrsqrt.f32 %v1090_v23 }
0x13ea   :  { %v3408_v25 = vpop.eup %3407 }
0x13eb   :  { %v1092_v26 = vmin.f32 %v3408_v25, 1.0 }
0x13ed   :  { %v1093_v29 = vmul.f32 %v1092_v26, %v1086_v19 }
0x13ef   :  { %2625 = vmatmul.mubr.f32.vlgmr.msra.gmra.mrb[12].mxu1 %v1093_v29 }
0x13f0   :  { %3234 = vmatpush3.bf16.msra.mxu1 %v3526_v5  ;;  %2694 = vmatprep.mubr.msk.f32.mxu1 %vm3473_vm1, %v3474_v28 }
0x13f1   :  { %3235 = vmatprep.subr.bf16.mxu1 %v3472_v4 }
0x13f4   :  { %3237 = vmatpush3.bf16.msra.mxu1 %v3537_v9 }
0x13f5   :  { %3238 = vmatprep.subr.bf16.mxu1 %v3472_v4 }
0x13f8   :  { %3240 = vmatpush3.bf16.msra.mxu1 %v3549_v12 }
0x13f9   :  { %3241 = vmatprep.subr.bf16.mxu1 %v3472_v4 }
0x13fc   :  { %3243 = vmatpush3.bf16.msra.mxu1 %v3561_v15 }
0x13fd   :  { %3244 = vmatprep.subr.bf16.mxu1 %v3472_v4 }
0x1400   :  { %3246 = vmatpush3.bf16.msra.mxu1 %v3575_v18 }
0x1401   :  { %3247 = vmatprep.subr.bf16.mxu1 %v3472_v4 }
0x1404   :  { %3249 = vmatpush3.bf16.msra.mxu1 %v3587_v21 }
0x1405   :  { %3250 = vmatprep.subr.bf16.mxu1 %v3472_v4 }
0x1408   :  { %3252 = vmatpush3.bf16.msra.mxu1 %v3599_v24 }
0x1409   :  { %3253 = vmatprep.subr.bf16.mxu1 %v3472_v4 }
0x140c   :  { %3255 = vmatpush3.bf16.msra.mxu1 %v3611_v27 }
0x140d   :  { %3280 = vmatprep.subr.bf16.mxu1 %v3472_v4 }
0x14c2   :  { %v1160_v30 = vpop.f32.mrb[12].mxu1 }
0x14c3   :  { %v1161_v31 = vadd.f32 %v1160_v30, %v3644_v33  ;;  %v2626_v32 = vpop.f32.mrb[13].mxu1 }
0x14c5   :  { %v1164_v34 = vmul.f32 0.0009765625, %v1161_v31 }
0x14c7   :  { %v1165_v35 = vmul.f32 0.001, %v1164_v34 }
0x14c9   :  { %v1166_v36 = vsub.f32 %v1093_v29, %v1165_v35 }
0x14cb   :  { %v1167_v37 = vmul.f32 %v1166_v36, %v1166_v36 }
0x14cd   :  { %v1168_v38 = vsel %vm30_vm0, %v1167_v37, 0.0 }
0x14ce   :  { %1169 = vadd.xlane.f32.xlu0 %v1168_v38 }
0x155b   :  { %v1170_v39 = vpop.xlane.xlu0 %1169 }
0x155c   :  { %3409 = vrsqrt.f32 %v1170_v39 }
0x1566   :  { %v3410_v40 = vpop.eup %3409 }
0x1567   :  { %v1172_v41 = vmin.f32 %v3410_v40, 1.0 }
0x1569   :  { %v1173_v42 = vmul.f32 %v1172_v41, %v1166_v36 }
0x156b   :  { %2660 = vmatmul.mubr.f32.vlgmr.msra.gmra.mrb[14].mxu0 %v1173_v42 }
0x156c   :  { %3258 = vmatpush3.bf16.msra.mxu0 %v3526_v5  ;;  %2729 = vmatprep.mubr.msk.f32.mxu0 %vm3473_vm1, %v3474_v28 }
0x156d   :  { %3259 = vmatprep.subr.bf16.mxu0 %v3472_v4 }
0x1570   :  { %3261 = vmatpush3.bf16.msra.mxu0 %v3537_v9 }
0x1571   :  { %3262 = vmatprep.subr.bf16.mxu0 %v3472_v4 }
0x1574   :  { %3264 = vmatpush3.bf16.msra.mxu0 %v3549_v12 }
0x1575   :  { %3265 = vmatprep.subr.bf16.mxu0 %v3472_v4 }
0x1578   :  { %3267 = vmatpush3.bf16.msra.mxu0 %v3561_v15 }
0x1579   :  { %3268 = vmatprep.subr.bf16.mxu0 %v3472_v4 }
0x157c   :  { %3270 = vmatpush3.bf16.msra.mxu0 %v3575_v18 }
0x157d   :  { %3271 = vmatprep.subr.bf16.mxu0 %v3472_v4 }
0x1580   :  { %3273 = vmatpush3.bf16.msra.mxu0 %v3587_v21 }
0x1581   :  { %3274 = vmatprep.subr.bf16.mxu0 %v3472_v4 }
0x1584   :  { %3276 = vmatpush3.bf16.msra.mxu0 %v3599_v24 }
0x1585   :  { %3277 = vmatprep.subr.bf16.mxu0 %v3472_v4 }
0x1588   :  { %3279 = vmatpush3.bf16.msra.mxu0 %v3611_v27 }
0x1589   :  { %3304 = vmatprep.subr.bf16.mxu0 %v3472_v4 }
0x163e   :  { %v1240_v43 = vpop.f32.mrb[14].mxu0 }
0x163f   :  { %v1241_v44 = vadd.f32 %v1240_v43, %v3644_v33  ;;  %v2661_v45 = vpop.f32.mrb[15].mxu0  ;;  %v1659_v43 = vld [vmem:[%s4083_s3 + $0x10] sm:$0xff] }
0x1640   :  { %v1660_v45 = vld [vmem:[%s4083_s3 + $0x18] sm:$0xff] }
0x1641   :  { %v1244_v46 = vmul.f32 0.0009765625, %v1241_v44 }
0x1643   :  { %v1245_v47 = vmul.f32 0.001, %v1244_v46  ;;  %v3356_v46 = vpack.c.bf16 %v1660_v45, %v1659_v43 }
0x1645   :  { %v1246_v48 = vsub.f32 %v1173_v42, %v1245_v47  ;;  %v1658_v42 = vld [vmem:[%s4083_s3 + $0x8] sm:$0xff] }
0x1647   :  { %v1247_v49 = vmul.f32 %v1246_v48, %v1246_v48 }
0x1649   :  { %v1248_v50 = vsel %vm30_vm0, %v1247_v49, 0.0 }
0x164a   :  { %1249 = vadd.xlane.f32.xlu1 %v1248_v50 }
0x16d7   :  { %v1250_v51 = vpop.xlane.xlu1 %1249 }
0x16d8   :  { %3411 = vrsqrt.f32 %v1250_v51 }
0x16e2   :  { %v3412_v52 = vpop.eup %3411 }
0x16e3   :  { %v1252_v53 = vmin.f32 %v3412_v52, 1.0 }
0x16e5   :  { %v1253_v54 = vmul.f32 %v1252_v53, %v1246_v48 }
0x16e7   :  { %2695 = vmatmul.mubr.f32.vlgmr.msra.gmra.mrb[14].mxu1 %v1253_v54 }
0x16e8   :  { %3282 = vmatpush3.bf16.msra.mxu1 %v3526_v5  ;;  %2764 = vmatprep.mubr.msk.f32.mxu1 %vm3473_vm1, %v3474_v28 }
0x16e9   :  { %3283 = vmatprep.subr.bf16.mxu1 %v3472_v4 }
0x16ec   :  { %3285 = vmatpush3.bf16.msra.mxu1 %v3537_v9 }
0x16ed   :  { %3286 = vmatprep.subr.bf16.mxu1 %v3472_v4 }
0x16f0   :  { %3288 = vmatpush3.bf16.msra.mxu1 %v3549_v12 }
0x16f1   :  { %3289 = vmatprep.subr.bf16.mxu1 %v3472_v4 }
0x16f4   :  { %3291 = vmatpush3.bf16.msra.mxu1 %v3561_v15 }
0x16f5   :  { %3292 = vmatprep.subr.bf16.mxu1 %v3472_v4 }
0x16f8   :  { %3294 = vmatpush3.bf16.msra.mxu1 %v3575_v18 }
0x16f9   :  { %3295 = vmatprep.subr.bf16.mxu1 %v3472_v4 }
0x16fc   :  { %3297 = vmatpush3.bf16.msra.mxu1 %v3587_v21 }
0x16fd   :  { %3298 = vmatprep.subr.bf16.mxu1 %v3472_v4 }
0x1700   :  { %3300 = vmatpush3.bf16.msra.mxu1 %v3599_v24 }
0x1701   :  { %3301 = vmatprep.subr.bf16.mxu1 %v3472_v4 }
0x1704   :  { %3303 = vmatpush3.bf16.msra.mxu1 %v3611_v27 }
0x1705   :  { %3328 = vmatprep.subr.bf16.mxu1 %v3472_v4 }
0x17ba   :  { %v1320_v55 = vpop.f32.mrb[14].mxu1 }
0x17bb   :  { %v1321_v56 = vadd.f32 %v1320_v55, %v3644_v33  ;;  %v2696_v57 = vpop.f32.mrb[15].mxu1  ;;  %v1661_v55 = vld [vmem:[%s4083_s3 + $0x20] sm:$0xff] }
0x17bd   :  { %v1324_v58 = vmul.f32 0.0009765625, %v1321_v56  ;;  %v1662_v56 = vld [vmem:[%s4083_s3 + $0x28] sm:$0xff] }
0x17be   :  { %v3359_v57 = vpack.c.bf16 %v1662_v56, %v1661_v55 }
0x17bf   :  { %v1325_v59 = vmul.f32 0.001, %v1324_v58  ;;  %v1663_v58 = vld [vmem:[%s4083_s3 + $0x30] sm:$0xff] }
0x17c1   :  { %v1326_v60 = vsub.f32 %v1253_v54, %v1325_v59  ;;  %v1664_v59 = vld [vmem:[%s4083_s3 + $0x38] sm:$0xff] }
0x17c3   :  { %v1327_v61 = vmul.f32 %v1326_v60, %v1326_v60 }
0x17c5   :  { %v1328_v62 = vsel %vm30_vm0, %v1327_v61, 0.0  ;;  %v1665_v61 = vld [vmem:[%s4083_s3 + $0x40] sm:$0xff] }
0x17c6   :  { %1329 = vadd.xlane.f32.xlu0 %v1328_v62  ;;  %v1666_v62 = vld [vmem:[%s4083_s3 + $0x48] sm:$0xff] }
0x1853   :  { %v1330_v63 = vpop.xlane.xlu0 %1329 }
0x1854   :  { %3413 = vrsqrt.f32 %v1330_v63  ;;  %v3365_v63 = vpack.c.bf16 %v1666_v62, %v1665_v61 }
0x185e   :  { %v3414_v0 = vpop.eup %3413 }
0x185f   :  { %v1332_v1 = vmin.f32 %v3414_v0, 1.0  ;;  %v1667_v0 = vld [vmem:[%s4083_s3 + $0x50] sm:$0xff] }
0x1861   :  { %v1333_v2 = vmul.f32 %v1332_v1, %v1326_v60  ;;  %v3362_v60 = vpack.c.bf16 %v1664_v59, %v1663_v58  ;;  %v1668_v1 = vld [vmem:[%s4083_s3 + $0x58] sm:$0xff] }
0x1863   :  { %2730 = vmatmul.mubr.f32.vlgmr.msra.gmra.mrb[16].mxu0 %v1333_v2 }
0x1864   :  { %3306 = vmatpush3.bf16.msra.mxu0 %v3526_v5  ;;  %2799 = vmatprep.mubr.msk.f32.mxu0 %vm3473_vm1, %v3474_v28 }
0x1865   :  { %3307 = vmatprep.subr.bf16.mxu0 %v3472_v4 }
0x1868   :  { %3309 = vmatpush3.bf16.msra.mxu0 %v3537_v9 }
0x1869   :  { %3310 = vmatprep.subr.bf16.mxu0 %v3472_v4 }
0x186c   :  { %3312 = vmatpush3.bf16.msra.mxu0 %v3549_v12 }
0x186d   :  { %3313 = vmatprep.subr.bf16.mxu0 %v3472_v4 }
0x1870   :  { %3315 = vmatpush3.bf16.msra.mxu0 %v3561_v15 }
0x1871   :  { %3316 = vmatprep.subr.bf16.mxu0 %v3472_v4 }
0x1874   :  { %3318 = vmatpush3.bf16.msra.mxu0 %v3575_v18 }
0x1875   :  { %3319 = vmatprep.subr.bf16.mxu0 %v3472_v4 }
0x1878   :  { %3321 = vmatpush3.bf16.msra.mxu0 %v3587_v21 }
0x1879   :  { %3322 = vmatprep.subr.bf16.mxu0 %v3472_v4 }
0x187c   :  { %3324 = vmatpush3.bf16.msra.mxu0 %v3599_v24 }
0x187d   :  { %3325 = vmatprep.subr.bf16.mxu0 %v3472_v4 }
0x1880   :  { %3327 = vmatpush3.bf16.msra.mxu0 %v3611_v27 }
0x1881   :  { %3352 = vmatprep.subr.bf16.mxu0 %v3472_v4 }
0x1936   :  { %v1400_v33 = vpop.f32.mrb[16].mxu0 }
0x1937   :  { %v1401_v6 = vadd.f32 %v3969_v3, %v1400_v33  ;;  %v2731_v7 = vpop.f32.mrb[17].mxu0  ;;  %v1669_v33 = vld [vmem:[%s4083_s3 + $0x60] sm:$0xff] }
0x1938   :  { %v1671_v7 = vld [vmem:[%s4083_s3 + $0x70] sm:$0xff] }
0x1939   :  { %v1404_v8 = vmul.f32 0.0009765625, %v1401_v6 }
0x193b   :  { %v1405_v10 = vmul.f32 0.001, %v1404_v8  ;;  %v1672_v8 = vld [vmem:[%s4083_s3 + $0x78] sm:$0xff] }
0x193d   :  { %v1406_v11 = vsub.f32 %v1333_v2, %v1405_v10  ;;  %v3368_v2 = vpack.c.bf16 %v1668_v1, %v1667_v0  ;;  %v3374_v10 = vpack.c.bf16 %v1672_v8, %v1671_v7 }
0x193f   :  { %v1407_v13 = vmul.f32 %v1406_v11, %v1406_v11 }
0x1941   :  { %v1408_v14 = vsel %vm30_vm0, %v1407_v13, 0.0 }
0x1942   :  { %1409 = vadd.xlane.f32.xlu1 %v1408_v14 }
0x19cf   :  { %v1410_v16 = vpop.xlane.xlu1 %1409 }
0x19d0   :  { %3415 = vrsqrt.f32 %v1410_v16 }
0x19da   :  { %v3416_v17 = vpop.eup %3415 }
0x19db   :  { %v1412_v19 = vmin.f32 %v3416_v17, 1.0 }
0x19dd   :  { %v1413_v20 = vmul.f32 %v1412_v19, %v1406_v11 }
0x19df   :  { %2765 = vmatmul.mubr.f32.vlgmr.msra.gmra.mrb[16].mxu1 %v1413_v20 }
0x19e0   :  { %3330 = vmatpush3.bf16.msra.mxu1 %v3526_v5  ;;  %2834 = vmatprep.mubr.msk.f32.mxu1 %vm3473_vm1, %v3474_v28 }
0x19e1   :  { %3331 = vmatprep.subr.bf16.mxu1 %v3472_v4 }
0x19e4   :  { %3333 = vmatpush3.bf16.msra.mxu1 %v3537_v9 }
0x19e5   :  { %3334 = vmatprep.subr.bf16.mxu1 %v3472_v4 }
0x19e8   :  { %3336 = vmatpush3.bf16.msra.mxu1 %v3549_v12 }
0x19e9   :  { %3337 = vmatprep.subr.bf16.mxu1 %v3472_v4 }
0x19ec   :  { %3339 = vmatpush3.bf16.msra.mxu1 %v3561_v15 }
0x19ed   :  { %3340 = vmatprep.subr.bf16.mxu1 %v3472_v4 }
0x19f0   :  { %3342 = vmatpush3.bf16.msra.mxu1 %v3575_v18 }
0x19f1   :  { %3343 = vmatprep.subr.bf16.mxu1 %v3472_v4 }
0x19f4   :  { %3345 = vmatpush3.bf16.msra.mxu1 %v3587_v21 }
0x19f5   :  { %3346 = vmatprep.subr.bf16.mxu1 %v3472_v4 }
0x19f8   :  { %3348 = vmatpush3.bf16.msra.mxu1 %v3599_v24 }
0x19f9   :  { %3349 = vmatprep.subr.bf16.mxu1 %v3472_v4 }
0x19fc   :  { %3351 = vmatpush3.bf16.msra.mxu1 %v3611_v27 }
0x1ab2   :  { %v1480_v5 = vpop.f32.mrb[16].mxu1 }
0x1ab3   :  { %v1481_v9 = vadd.f32 %v3969_v3, %v1480_v5  ;;  %v2766_v12 = vpop.f32.mrb[17].mxu1 }
0x1ab5   :  { %v1484_v15 = vmul.f32 0.0009765625, %v1481_v9 }
0x1ab7   :  { %v1485_v22 = vmul.f32 0.001, %v1484_v15 }
0x1ab9   :  { %v1486_v23 = vsub.f32 %v1413_v20, %v1485_v22 }
0x1abb   :  { %v1487_v18 = vmul.f32 %v1486_v23, %v1486_v23 }
0x1abd   :  { %v1488_v25 = vsel %vm30_vm0, %v1487_v18, 0.0 }
0x1abe   :  { %1489 = vadd.xlane.f32.xlu0 %v1488_v25 }
0x1b4b   :  { %v1490_v21 = vpop.xlane.xlu0 %1489 }
0x1b4c   :  { %3417 = vrsqrt.f32 %v1490_v21 }
0x1b56   :  { %v3418_v26 = vpop.eup %3417 }
0x1b57   :  { %v1492_v29 = vmin.f32 %v3418_v26, 1.0 }
0x1b59   :  { %v1493_v24 = vmul.f32 %v1492_v29, %v1486_v23 }
0x1b5b   :  { %2800 = vmatmul.mubr.f32.vlgmr.msra.gmra.mrb[18].mxu0 %v1493_v24 }
0x1b5c   :  { %2869 = vmatprep.mubr.msk.f32.mxu0 %vm3473_vm1, %v3474_v28  ;;  %v1657_v28 = vld [vmem:[%s4083_s3] sm:$0xff] }
0x1b5d   :  { %v3353_v44 = vpack.c.bf16 %v1658_v42, %v1657_v28 }
0x1b5f   :  { %3354 = vmatpush3.bf16.msra.mxu0 %v3353_v44 }
0x1b60   :  { %3355 = vmatprep.subr.bf16.mxu0 %v3472_v4 }
0x1b63   :  { %3357 = vmatpush3.bf16.msra.mxu0 %v3356_v46 }
0x1b64   :  { %3358 = vmatprep.subr.bf16.mxu0 %v3472_v4 }
0x1b67   :  { %3360 = vmatpush3.bf16.msra.mxu0 %v3359_v57 }
0x1b68   :  { %3361 = vmatprep.subr.bf16.mxu0 %v3472_v4 }
0x1b6b   :  { %3363 = vmatpush3.bf16.msra.mxu0 %v3362_v60 }
0x1b6c   :  { %3364 = vmatprep.subr.bf16.mxu0 %v3472_v4 }
0x1b6f   :  { %3366 = vmatpush3.bf16.msra.mxu0 %v3365_v63 }
0x1b70   :  { %3367 = vmatprep.subr.bf16.mxu0 %v3472_v4 }
0x1b73   :  { %3369 = vmatpush3.bf16.msra.mxu0 %v3368_v2 }
0x1b74   :  { %3370 = vmatprep.subr.bf16.mxu0 %v3472_v4 }
0x1c2e   :  { %v1560_v27 = vpop.f32.mrb[18].mxu0 }
0x1c2f   :  { %v1561_v30 = vadd.f32 %v3969_v3, %v1560_v27  ;;  %v2801_v31 = vpop.f32.mrb[19].mxu0 }
0x1c31   :  { %v1564_v32 = vmul.f32 0.0009765625, %v1561_v30 }
0x1c33   :  { %v1565_v34 = vmul.f32 0.001, %v1564_v32 }
0x1c35   :  { %v1566_v35 = vsub.f32 %v1493_v24, %v1565_v34 }
0x1c37   :  { %v1567_v36 = vmul.f32 %v1566_v35, %v1566_v35 }
0x1c39   :  { %v1568_v37 = vsel %vm30_vm0, %v1567_v36, 0.0 }
0x1c3a   :  { %1569 = vadd.xlane.f32.xlu1 %v1568_v37 }
0x1cc7   :  { %v1570_v38 = vpop.xlane.xlu1 %1569 }
0x1cc8   :  { %3419 = vrsqrt.f32 %v1570_v38 }
0x1cd2   :  { %v3420_v39 = vpop.eup %3419 }
0x1cd3   :  { %v1572_v40 = vmin.f32 %v3420_v39, 1.0 }
0x1cd5   :  { %v1573_v41 = vmul.f32 %v1572_v40, %v1566_v35 }
0x1cd7   :  { %2835 = vmatmul.mubr.f32.vlgmr.msra.gmra.mrb[18].mxu1 %v1573_v41 }
0x1daa   :  { %v1640_v47 = vpop.f32.mrb[18].mxu1 }
0x1dab   :  { %v1641_v48 = vadd.f32 %v3969_v3, %v1640_v47  ;;  %v2836_v49 = vpop.f32.mrb[19].mxu1  ;;  %v1670_v3 = vld [vmem:[%s4083_s3 + $0x68] sm:$0xff] }
0x1dac   :  { %v3371_v6 = vpack.c.bf16 %v1670_v3, %v1669_v33 }
0x1dad   :  { %v1644_v50 = vmul.f32 0.0009765625, %v1641_v48 }
0x1dae   :  { %3372 = vmatpush3.bf16.msra.mxu0 %v3371_v6 }
0x1daf   :  { %v1645_v51 = vmul.f32 0.001, %v1644_v50  ;;  %3373 = vmatprep.subr.bf16.mxu0 %v3472_v4 }
0x1db1   :  { %v1646_v52 = vsub.f32 %v1573_v41, %v1645_v51 }
0x1db2   :  { %3375 = vmatpush3.bf16.msra.mxu0 %v3374_v10 }
0x1db3   :  { %v1647_v53 = vmul.f32 %v1646_v52, %v1646_v52 }
0x1db5   :  { %v1648_v54 = vsel %vm30_vm0, %v1647_v53, 0.0 }
0x1db6   :  { %1649 = vadd.xlane.f32.xlu0 %v1648_v54 }
0x1e43   :  { %v1650_v11 = vpop.xlane.xlu0 %1649 }
0x1e44   :  { %3421 = vrsqrt.f32 %v1650_v11 }
0x1e4e   :  { %v3422_v13 = vpop.eup %3421 }
0x1e4f   :  { %v1652_v14 = vmin.f32 %v3422_v13, 1.0 }
0x1e51   :  { %v1653_v16 = vmul.f32 %v1652_v14, %v1646_v52 }
0x1e53   :  { %1654 = vst [vmem:[#allocation2] sm:$0x3] %v1653_v16  ;;  %1655 = vst [vmem:[#allocation3] sm:$0x3] %v1653_v16 }
0x1e5a   :  { %v1656_v17 = vld [vmem:[#allocation2] sm:$0x3] }
0x1e5b   :  { %2870 = vmatmul.mubr.f32.vlgmr.msra.gmra.mrb[20].mxu0 %v1656_v17 }
0x1e5c   :  { %3435 = shalt.err (!%p3432_p4)
}
0x1e5d   :  { %s3436_s16 = scalar_lea.hbm %s4085_s5, 32 }
0x1e5e   :  { %p3437_p5 = scmp.ne.s32.totalorder %s4085_s5, %s3436_s16  ;;  %p3440_p6 = scmp.lt.u32.totalorder %s3436_s16, %s4085_s5 }
0x1e60   :  { %p3442_p7 = pnand %p3440_p6, %p3437_p5 }
0x1e62   :  { %3445 = shalt.err (!%p3442_p7)
}
0x1e63   :  { %1760 = dma.vmem_to_hbm [thread:$0]  %s1758_s13, 32, %s4085_s5, [#allocation4]   ;;  %v1779_v4 = vld [vmem:[%s4084_s4] ss:$0 sm:$0xff] }
0x1e64   :  { %s3476_s25 = smov [#allocation5]  }
0x1e65   :  { %s1767_s26 = sshll.u32 %s3476_s25, 4  ;;  %s1768_s26 = int_to_ptr.vmem [resolvable:$true] %s1767_s26 }
0x1e66   :  { %s3446_s27 = scalar_lea.vmem %s1768_s26, 32  ;;  %p3451_p9 = scmp.lt.s32.totalorder %s1768_s26, %s1768_s26 }
0x1e67   :  { %p3447_p8 = scmp.ne.s32.totalorder %s1768_s26, %s3446_s27  ;;  %p3452_p10 = scmp.lt.s32.totalorder %s3446_s27, %s3446_s27 }
0x1e69   :  { %p3453_p11 = por %p3452_p10, %p3451_p9 }
0x1e6b   :  { %p3454_p12 = pnand %p3453_p11, %p3447_p8 }
0x1f2e   :  { %v1746_v19 = vpop.f32.mrb[20].mxu0 }
0x1f2f   :  { %v1747_v20 = vadd.f32 %v1779_v4, %v1746_v19  ;;  %v2871_v5 = vpop.f32.mrb[21].mxu0 }
0x1f31   :  { %1750 = vst [vmem:[#allocation5] sm:$0x3] %v1747_v20 }
0x1f32   :  { %3457 = shalt.err (!%p3454_p12)
}
0x1f33   :  { %s3458_s28 = scalar_lea.hbm %s4086_s6, 32 }
0x1f34   :  { %p3459_p13 = scmp.ne.s32.totalorder %s4086_s6, %s3458_s28  ;;  %p3462_p0 = scmp.lt.u32.totalorder %s3458_s28, %s4086_s6 }
0x1f36   :  { %p3464_p1 = pnand %p3462_p0, %p3459_p13 }
0x1f38   :  { %3467 = shalt.err (!%p3464_p1)
}
0x1f39   :  { %1770 = dma.vmem_to_hbm [thread:$0]  %s1768_s26, 32, %s4086_s6, [#allocation6]  }
0x1f3a   :  { %3468 = dma.done.wait [#allocation4], 32  }
0x1f3b   :  { %3469 = vsyncadd [#allocation4], 4294967264 }
0x1f3c   :  { %3470 = dma.done.wait [#allocation6], 32  }
0x1f3d   :  { %3471 = vsyncadd [#allocation6], 4294967264 }
0x1f3e   :  { %1777 = vsyncpa [#allocation4], 1 }
0x1f3f   :  { %1778 = vsyncpa [#allocation6], 1 }

</bundles_post_ra>
